<compile_context>
chip_gen: v7x
topology: tpu7x:2x2x1
jax: 0.10.0
libtpu: 0.0.40
codegen_flags: <defaults>
</compile_context>

<pallas_src>
import math

import jax
import jax.numpy as jnp
from jax import lax
from jax.experimental import pallas as pl
from jax.experimental.pallas import tpu as pltpu


def _round_up(x, m):
    return ((x + m - 1) // m) * m


def _attention_kernel(h_ref, mask_ref, wbd_ref, expand_ref, reduce_ref, out_ref):
    # h_ref   : (TB, S*D)  lane-dense flat H tile
    # mask_ref: (TB, S)    raw mask values
    # wbd_ref : (S*D, S)   block-diagonal attn weight (scale folded in)
    # expand  : (S, S*D)   0/1 matrix, p -> p repeated over each D-lane segment
    # reduce  : (S*D, D)   0/1 matrix, segment-sum over S
    h = h_ref[...]
    if h.dtype != jnp.float32:
        h = h.astype(jnp.float32)          # in-register widen (bf16 input path)
    m = mask_ref[...]

    # scores[b,s] = sum_d H[b,s,d] * w[d] / sqrt(D)
    # Block-diagonal matmul on the (otherwise idle) MXU, K = S*D, lane-dense.
    # precision=HIGHEST keeps full f32 fidelity through the softmax.
    scores = jnp.dot(h, wbd_ref[...],
                     preferred_element_type=jnp.float32,
                     precision=lax.Precision.HIGHEST)              # (TB, S)
    scores = scores + jnp.where(m > 0, 0.0, -10000.0)

    # Softmax over the sequence axis (torch dim=-2) — tiny (TB, S) work.
    mx = jnp.max(scores, axis=-1, keepdims=True)
    p = jnp.exp(scores - mx)                                       # unnormalized
    denom = jnp.sum(p, axis=-1, keepdims=True)                     # (TB, 1)

    # p_exp[b, s*D + d] = p[b, s]  (lane-dense expansion via 0/1 matrix).
    p_exp = jnp.dot(p, expand_ref[...],
                    preferred_element_type=jnp.float32,
                    precision=lax.Precision.HIGHEST)               # (TB, S*D)

    weighted = h * p_exp                                           # 1 VPU mul / elem

    # out[b, d] = sum_s weighted[b, s*D + d]  (segment-sum via 0/1 matrix).
    acc = jnp.dot(weighted, reduce_ref[...],
                  preferred_element_type=jnp.float32,
                  precision=lax.Precision.HIGHEST)                 # (TB, D)

    # Exact normalization: TB reciprocals + TB*D muls (negligible).
    inv = 1.0 / denom
    out_ref[...] = (acc * inv).astype(out_ref.dtype)


def _vmem_capacity_bytes():
    """Physical VMEM per TensorCore; conservative 64 MiB fallback (v7x)."""
    try:
        info = pltpu.get_tpu_info()
        cap = getattr(info, "vmem_capacity_bytes", None)
        if cap:
            return int(cap)
    except Exception:
        pass
    return 64 * 1024 * 1024


def _choose_batch_tile(B, S, D, h_itemsize, vmem_budget_bytes, max_batch_tile):
    """Batch rows per grid step, using physical (8,128)-padded tile sizes."""
    SD = S * D
    SD_pad = _round_up(SD, 128)
    S_pad = _round_up(S, 128)
    D_pad = _round_up(D, 128)

    # Double-buffered pipeline buffers (H + mask + out) ...
    io_per_row = 2 * (SD_pad * h_itemsize + S_pad * 4 + D_pad * 4)
    # ... plus ~3 lane-dense f32 temporaries the compiler keeps live in VMEM
    # (h widened to f32, p_exp, weighted).
    tmp_per_row = 3 * SD_pad * 4
    bytes_per_row = io_per_row + tmp_per_row

    # Shared constant operands (conservatively counted double-buffered).
    const_bytes = 2 * 4 * (_round_up(SD, 8) * S_pad      # block-diag weight
                           + _round_up(S, 8) * SD_pad    # expand
                           + _round_up(SD, 8) * D_pad)   # reduce
    avail = vmem_budget_bytes - const_bytes

    if B <= 8:
        return B                                    # full-extent block, always legal

    if avail < 8 * bytes_per_row:
        # Do NOT silently round up past the budget.
        # TODO(synk): add an S/D tiling path for very large per-row footprints.
        raise ValueError(
            f"VMEM budget {vmem_budget_bytes}B too small for 8 padded batch rows "
            f"(need {8 * bytes_per_row + const_bytes}B); raise the budget or tile S/D.")

    tb = avail // bytes_per_row
    if tb >= B:
        tb = B                                      # full extent (legal for any B)
    else:
        tb = (tb // 8) * 8                          # keep (8,128)-legal partial blocks

    # v7x megacore: keep >= 2 grid steps so both TensorCores get work.
    if B >= 16:
        tb = min(tb, _round_up(pl.cdiv(B, 2), 8))

    # Cap to keep per-op vreg unrolling / live values sane; 2048 rows already
    # gives ~2 MiB contiguous H DMAs per step (per-step overhead well hidden).
    return min(tb, _round_up(max_batch_tile, 8))


def attention_forward(H, mask, w, *, vmem_budget_bytes=None, max_batch_tile=2048):
    """H: (B,S,D) f32/bf16, mask: (B,S) (>0 == keep), w: (1,D) f32. Returns (B,D) f32."""
    H = jnp.asarray(H)
    B, S, D = H.shape
    SD = S * D
    if H.dtype not in (jnp.float32, jnp.bfloat16):
        H = H.astype(jnp.float32)
    h_flat = H.reshape(B, SD)                       # free: contiguous trailing dims
    mask2 = jnp.asarray(mask).reshape(B, S).astype(jnp.float32)
    w_vec = jnp.asarray(w).reshape(D).astype(jnp.float32)

    # Constant matrices (tiny): scale folded into the block-diagonal weight.
    scale = 1.0 / math.sqrt(float(D))
    eye_s = jnp.eye(S, dtype=jnp.float32)
    wbd = jnp.kron(eye_s, (w_vec * scale).reshape(D, 1))            # (S*D, S)
    expand = jnp.kron(eye_s, jnp.ones((1, D), jnp.float32))         # (S, S*D)
    reduce_m = jnp.tile(jnp.eye(D, dtype=jnp.float32), (S, 1))      # (S*D, D)

    # Per-generation VMEM budget/limit:
    #   v7x (64 MiB physical): ~32 MiB working set, 48 MiB scoped limit.
    #   v5e/v6e (128 MiB):     ~64 MiB working set, 96 MiB scoped limit.
    cap = _vmem_capacity_bytes()
    if vmem_budget_bytes is None:
        vmem_budget_bytes = cap // 2
    vmem_limit_bytes = min((cap * 3) // 4, 100 * 1024 * 1024)

    tb = _choose_batch_tile(B, S, D, jnp.dtype(H.dtype).itemsize,
                            vmem_budget_bytes, max_batch_tile)
    grid = (pl.cdiv(B, tb),)
    # NOTE: when B % tb != 0 the trailing block reads padded rows; every op is
    # row-independent (elementwise / row-reduce / M-dim of the matmuls), so any
    # garbage/inf in padded rows cannot contaminate valid rows, and their
    # writes are dropped by Pallas.

    out = pl.pallas_call(
        _attention_kernel,
        out_shape=jax.ShapeDtypeStruct((B, D), jnp.float32),
        grid_spec=pltpu.PrefetchScalarGridSpec(
            num_scalar_prefetch=0,
            grid=grid,
            in_specs=[
                pl.BlockSpec((tb, SD), lambda i: (i, 0)),   # H, lane-dense flat slab
                pl.BlockSpec((tb, S), lambda i: (i, 0)),    # mask
                pl.BlockSpec((SD, S), lambda i: (0, 0)),    # block-diag weight (shared)
                pl.BlockSpec((S, SD), lambda i: (0, 0)),    # expand matrix (shared)
                pl.BlockSpec((SD, D), lambda i: (0, 0)),    # reduce matrix (shared)
            ],
            out_specs=pl.BlockSpec((tb, D), lambda i: (i, 0)),
        ),
        compiler_params=pltpu.CompilerParams(
            dimension_semantics=("parallel",),   # megacore sharding on v7x
            vmem_limit_bytes=vmem_limit_bytes,
        ),
    )(h_flat, mask2, wbd, expand, reduce_m)
    return out


def attention_ref(H, mask, w):
    """Pure-JAX (full f32, no MXU) reference mirroring the PyTorch forward."""
    H = jnp.asarray(H).astype(jnp.float32)
    B, S, D = H.shape
    wv = jnp.asarray(w).reshape(D).astype(jnp.float32)
    m = (jnp.asarray(mask).reshape(B, S) > 0).astype(jnp.float32)[..., None]
    bias = (1.0 - m) * -10000.0
    scores = jnp.sum(H * wv[None, None, :], axis=-1, keepdims=True)
    scores = scores / math.sqrt(float(D)) + bias                    # (B, S, 1)
    probs = jax.nn.softmax(scores, axis=-2)
    return jnp.sum(H * probs, axis=1)                               # (B, D)


if __name__ == "__main__":
    B, S = 2, 8
    hidden_size, num_trans_units = 24, 4
    D = hidden_size + 2 * num_trans_units   # feature dim seen by attn_weight (=32)

    key = jax.random.PRNGKey(0)
    k_h, k_m, k_w, k_h2, k_m2 = jax.random.split(key, 5)

    H = jax.random.normal(k_h, (B, S, D), dtype=jnp.float32)
    mask = jax.random.bernoulli(k_m, 0.7, (B, S)).astype(jnp.float32)
    # stand-in for nn.Linear(D, 1, bias=False).weight, shape (1, D)
    w = (jax.random.normal(k_w, (1, D), dtype=jnp.float32) / math.sqrt(D))

    out = jax.block_until_ready(attention_forward(H, mask, w))
    ref = attention_ref(H, mask, w)
    assert out.shape == (B, D)
    assert jnp.allclose(out, ref, atol=1e-4, rtol=1e-4), float(
        jnp.max(jnp.abs(out - ref)))

    # Larger batch: exercises the multi-step grid (megacore split path) and a
    # padded trailing block (B % tb != 0).
    B2 = 40
    H2 = jax.random.normal(k_h2, (B2, S, D), dtype=jnp.float32)
    mask_b2 = jax.random.bernoulli(k_m2, 0.7, (B2, S)).astype(jnp.float32)
    out2 = jax.block_until_ready(attention_forward(H2, mask_b2, w))
    ref2 = attention_ref(H2, mask_b2, w)
    assert jnp.allclose(out2, ref2, atol=1e-4, rtol=1e-4), float(
        jnp.max(jnp.abs(out2 - ref2)))

    print("KERNEL_OK")
</pallas_src>

<mosaic_0001>
module attributes {stable_mosaic.version = 11 : i64} {
  func.func @_attention_kernel(%arg0: i32, %arg1: memref<2x256xf32, #tpu.memory_space<vmem>>, %arg2: memref<2x8xf32, #tpu.memory_space<vmem>>, %arg3: memref<256x8xf32, #tpu.memory_space<vmem>>, %arg4: memref<8x256xf32, #tpu.memory_space<vmem>>, %arg5: memref<256x32xf32, #tpu.memory_space<vmem>>, %arg6: memref<2x32xf32, #tpu.memory_space<vmem>>) attributes {dimension_semantics = [#tpu.dimension_semantics<parallel>], iteration_bounds = array<i64: 1>, scalar_prefetch = 0 : i64, scratch_operands = 0 : i64, tpu.core_type = #tpu.core_type<tc>, window_params = [{transform_indices = @transform_0, window_bounds = array<i64: 2, 256>}, {transform_indices = @transform_1, window_bounds = array<i64: 2, 8>}, {pipeline_mode = #tpu.pipeline_mode<synchronous>, transform_indices = @transform_2, window_bounds = array<i64: 256, 8>}, {pipeline_mode = #tpu.pipeline_mode<synchronous>, transform_indices = @transform_3, window_bounds = array<i64: 8, 256>}, {pipeline_mode = #tpu.pipeline_mode<synchronous>, transform_indices = @transform_4, window_bounds = array<i64: 256, 32>}, {transform_indices = @transform_5, window_bounds = array<i64: 2, 32>}]} {
    %c0 = arith.constant 0 : index
    %c0_0 = arith.constant 0 : index
    %0 = vector.load %arg1[%c0, %c0_0] : memref<2x256xf32, #tpu.memory_space<vmem>>, vector<2x256xf32>
    %c0_1 = arith.constant 0 : index
    %c0_2 = arith.constant 0 : index
    %1 = vector.load %arg2[%c0_1, %c0_2] : memref<2x8xf32, #tpu.memory_space<vmem>>, vector<2x8xf32>
    %c0_3 = arith.constant 0 : index
    %c0_4 = arith.constant 0 : index
    %2 = vector.load %arg3[%c0_3, %c0_4] : memref<256x8xf32, #tpu.memory_space<vmem>>, vector<256x8xf32>
    %cst = arith.constant dense<0.000000e+00> : vector<2x8xf32>
    %3 = tpu.matmul %0, %2, %cst {dimension_numbers = #tpu.dot_dimension_numbers<[1], [0], [0], [1], [0, 0, 1, 1], [], []>, precision = #tpu.contract_precision<fp32>} : vector<2x256xf32>, vector<256x8xf32>, vector<2x8xf32> -> vector<2x8xf32>
    %cst_5 = arith.constant 0.000000e+00 : f32
    %4 = vector.broadcast %cst_5 : f32 to vector<2x8xf32>
    %5 = arith.cmpf ogt, %1, %4 : vector<2x8xf32>
    %cst_6 = arith.constant 0.000000e+00 : f32
    %cst_7 = arith.constant -1.000000e+04 : f32
    %6 = vector.broadcast %cst_6 : f32 to vector<2x8xf32>
    %7 = vector.broadcast %cst_7 : f32 to vector<2x8xf32>
    %8 = arith.select %5, %6, %7 : vector<2x8xi1>, vector<2x8xf32>
    %9 = arith.addf %3, %8 : vector<2x8xf32>
    %cst_8 = arith.constant dense<0xFF800000> : vector<2xf32>
    %10 = vector.multi_reduction <maximumf>, %9, %cst_8 [1] : vector<2x8xf32> to vector<2xf32>
    %11 = vector.shape_cast %10 : vector<2xf32> to vector<2x1xf32>
    %12 = vector.broadcast %11 : vector<2x1xf32> to vector<2x8xf32>
    %13 = arith.subf %9, %12 : vector<2x8xf32>
    %14 = math.exp %13 : vector<2x8xf32>
    %cst_9 = arith.constant dense<0.000000e+00> : vector<2xf32>
    %15 = vector.multi_reduction <add>, %14, %cst_9 [1] : vector<2x8xf32> to vector<2xf32>
    %16 = vector.shape_cast %15 : vector<2xf32> to vector<2x1xf32>
    %c0_10 = arith.constant 0 : index
    %c0_11 = arith.constant 0 : index
    %17 = vector.load %arg4[%c0_10, %c0_11] : memref<8x256xf32, #tpu.memory_space<vmem>>, vector<8x256xf32>
    %cst_12 = arith.constant dense<0.000000e+00> : vector<2x256xf32>
    %18 = tpu.matmul %14, %17, %cst_12 {dimension_numbers = #tpu.dot_dimension_numbers<[1], [0], [0], [1], [0, 0, 1, 1], [], []>, precision = #tpu.contract_precision<fp32>} : vector<2x8xf32>, vector<8x256xf32>, vector<2x256xf32> -> vector<2x256xf32>
    %19 = arith.mulf %0, %18 : vector<2x256xf32>
    %c0_13 = arith.constant 0 : index
    %c0_14 = arith.constant 0 : index
    %20 = vector.load %arg5[%c0_13, %c0_14] : memref<256x32xf32, #tpu.memory_space<vmem>>, vector<256x32xf32>
    %cst_15 = arith.constant dense<0.000000e+00> : vector<2x32xf32>
    %21 = tpu.matmul %19, %20, %cst_15 {dimension_numbers = #tpu.dot_dimension_numbers<[1], [0], [0], [1], [0, 0, 1, 1], [], []>, precision = #tpu.contract_precision<fp32>} : vector<2x256xf32>, vector<256x32xf32>, vector<2x32xf32> -> vector<2x32xf32>
    %cst_16 = arith.constant 1.000000e+00 : f32
    %22 = vector.broadcast %cst_16 : f32 to vector<2x1xf32>
    %23 = arith.divf %22, %16 : vector<2x1xf32>
    %24 = vector.broadcast %23 : vector<2x1xf32> to vector<2x32xf32>
    %25 = arith.mulf %21, %24 : vector<2x32xf32>
    %c0_17 = arith.constant 0 : index
    %c0_18 = arith.constant 0 : index
    %26 = vector.load %arg6[%c0_17, %c0_18] : memref<2x32xf32, #tpu.memory_space<vmem>>, vector<2x32xf32>
    tpu.vector_store %arg6[%c0_17, %c0_18], %25 {strides = array<i32>} : memref<2x32xf32, #tpu.memory_space<vmem>>, vector<2x32xf32>,
    return
  }
  func.func @transform_0(%arg0: i32) -> (i32, i32) {
    %c0_i32 = arith.constant 0 : i32
    %c0_i32_0 = arith.constant 0 : i32
    return %arg0, %c0_i32 : i32, i32
  }
  func.func @transform_1(%arg0: i32) -> (i32, i32) {
    %c0_i32 = arith.constant 0 : i32
    %c0_i32_0 = arith.constant 0 : i32
    return %arg0, %c0_i32 : i32, i32
  }
  func.func @transform_2(%arg0: i32) -> (i32, i32) {
    %c0_i32 = arith.constant 0 : i32
    %c0_i32_0 = arith.constant 0 : i32
    %c0_i32_1 = arith.constant 0 : i32
    return %c0_i32, %c0_i32_0 : i32, i32
  }
  func.func @transform_3(%arg0: i32) -> (i32, i32) {
    %c0_i32 = arith.constant 0 : i32
    %c0_i32_0 = arith.constant 0 : i32
    %c0_i32_1 = arith.constant 0 : i32
    return %c0_i32, %c0_i32_0 : i32, i32
  }
  func.func @transform_4(%arg0: i32) -> (i32, i32) {
    %c0_i32 = arith.constant 0 : i32
    %c0_i32_0 = arith.constant 0 : i32
    %c0_i32_1 = arith.constant 0 : i32
    return %c0_i32, %c0_i32_0 : i32, i32
  }
  func.func @transform_5(%arg0: i32) -> (i32, i32) {
    %c0_i32 = arith.constant 0 : i32
    %c0_i32_0 = arith.constant 0 : i32
    return %arg0, %c0_i32 : i32, i32
  }
}

</mosaic_0001>

<bundles_post_ra>
// kernel: tpu_custom_call.1
= control target key start
LH: loop header
LB: loop body
LE: loop exit
PB: predicated region body
PF: predicated region fallthrough
CT: control target
= control target key end

     0   :  { %v3195_v26 = vmov 1983009808   ;;  %s4433_s0 = inlined_call_operand.vmem [shape: f32[2,256], index: 0, kind: input, shape index: {}]   ;;  %s4434_s1 = inlined_call_operand.vmem [shape: f32[2,8], index: 1, kind: input, shape index: {}]   ;;  %s4435_s2 = inlined_call_operand.vmem [shape: f32[256,8], index: 2, kind: input, shape index: {}]   ;;  %s4436_s3 = inlined_call_operand.vmem [shape: f32[8,256], index: 3, kind: input, shape index: {}]   ;;  %s4437_s4 = inlined_call_operand.vmem [shape: f32[256,32], index: 4, kind: input, shape index: {}]   ;;  %s4438_s5 = inlined_call_operand.hbm [shape: f32[2,32], index: 5, kind: output, shape index: {}]  }
   0x1   :  { %v39_v0 = vld [vmem:[%s4435_s2 + $0x80] sm:$0xff]  ;;  %v40_v1 = vld [vmem:[%s4435_s2 + $0x88] sm:$0xff]  ;;  %v41_v7 = vld [vmem:[%s4435_s2 + $0x90] sm:$0xff]  ;;  %v3275_v27 = vunpack.c.l.s4 %v3195_v26 }
   0x2   :  { %v23_v2 = vld [vmem:[%s4435_s2] sm:$0xff]  ;;  %v117_v3 = vand.u32 4294901760, %v39_v0  ;;  %v120_v4 = vand.u32 4294901760, %v40_v1  ;;  %v24_v5 = vld [vmem:[%s4435_s2 + $0x8] sm:$0xff]  ;;  %v42_v8 = vld [vmem:[%s4435_s2 + $0x98] sm:$0xff]  ;;  %v123_v10 = vand.u32 4294901760, %v41_v7 }
   0x3   :  { %v69_v6 = vand.u32 4294901760, %v23_v2  ;;  %v72_v9 = vand.u32 4294901760, %v24_v5  ;;  %v126_v11 = vand.u32 4294901760, %v42_v8  ;;  %v25_v12 = vld [vmem:[%s4435_s2 + $0x10] sm:$0xff]  ;;  %v26_v13 = vld [vmem:[%s4435_s2 + $0x18] sm:$0xff]  ;;  %v43_v19 = vld [vmem:[%s4435_s2 + $0xa0] sm:$0xff] }
   0x4   :  { %v3253_v15 = vpack.c.bf16 %v120_v4, %v117_v3  ;;  %v75_v17 = vand.u32 4294901760, %v25_v12  ;;  %v78_v18 = vand.u32 4294901760, %v26_v13  ;;  %v44_v20 = vld [vmem:[%s4435_s2 + $0xa8] sm:$0xff]  ;;  %v27_v24 = vld [vmem:[%s4435_s2 + $0x20] sm:$0xff]  ;;  %v3278_v28 = vsub.f32 %v41_v7, %v123_v10  ;;  %v45_v40 = vld [vmem:[%s4435_s2 + $0xb0] sm:$0xff] }
   0x5   :  { %v3255_v16 = vsub.f32 %v23_v2, %v69_v6  ;;  %v3263_v21 = vpack.c.bf16 %v72_v9, %v69_v6  ;;  %v3265_v22 = vsub.f32 %v24_v5, %v72_v9  ;;  %v3267_v23 = vpack.c.bf16 %v126_v11, %v123_v10  ;;  %v28_v25 = vld [vmem:[%s4435_s2 + $0x28] sm:$0xff]  ;;  %v46_v45 = vld [vmem:[%s4435_s2 + $0xb8] sm:$0xff]  ;;  %v29_v58 = vld [vmem:[%s4435_s2 + $0x30] sm:$0xff] }
   0x6   :  { %2768 = vmatprep.subr.bf16.mxu0 %v3253_v15  ;;  %v3280_v29 = vsub.f32 %v42_v8, %v126_v11  ;;  %v3282_v30 = vpack.c.bf16 %v78_v18, %v75_v17  ;;  %v3284_v31 = vsub.f32 %v25_v12, %v75_v17  ;;  %v129_v32 = vand.u32 4294901760, %v43_v19  ;;  %v30_v59 = vld [vmem:[%s4435_s2 + $0x38] sm:$0xff] }
   0x7   :  { %2770 = vmatpush3.bf16.msra.mxu0 %v3263_v21  ;;  %v132_v33 = vand.u32 4294901760, %v44_v20  ;;  %v3287_v34 = vsub.f32 %v39_v0, %v117_v3  ;;  %v3289_v35 = vsub.f32 %v40_v1, %v120_v4  ;;  %v81_v36 = vand.u32 4294901760, %v27_v24 }
   0x8   :  { %2772 = vmatprep.subr.bf16.mxu0 %v3267_v23  ;;  %v84_v37 = vand.u32 4294901760, %v28_v25  ;;  %v4454_v38 = vand.u32 4294901760, %v3255_v16  ;;  %v4453_v39 = vand.u32 4294901760, %v3265_v22  ;;  %v3297_v41 = vsub.f32 %v26_v13, %v78_v18 }
   0x9   :  { %v3299_v42 = vpack.c.bf16 %v132_v33, %v129_v32  ;;  %v3301_v43 = vsub.f32 %v43_v19, %v129_v32  ;;  %v4457_v44 = vand.u32 4294901760, %v3287_v34  ;;  %v3307_v46 = vsub.f32 %v44_v20, %v132_v33 }
   0xa   :  { %v4456_v47 = vand.u32 4294901760, %v3289_v35  ;;  %v3310_v48 = vpack.c.bf16 %v84_v37, %v81_v36  ;;  %v3312_v49 = vsub.f32 %v27_v24, %v81_v36  ;;  %v184_v51 = vsub.f32 %v3255_v16, %v4454_v38 }
   0xb   :  { %2774 = vmatpush3.bf16.msra.mxu0 %v3282_v30  ;;  %v296_v50 = vsub.f32 %v3287_v34, %v4457_v44  ;;  %v191_v52 = vsub.f32 %v3265_v22, %v4453_v39  ;;  %v135_v53 = vand.u32 4294901760, %v45_v40  ;;  %v138_v55 = vand.u32 4294901760, %v46_v45 }
   0xc   :  { %2776 = vmatprep.subr.bf16.mxu0 %v3299_v42  ;;  %v303_v54 = vsub.f32 %v3289_v35, %v4456_v47  ;;  %v4452_v56 = vand.u32 4294901760, %v3278_v28  ;;  %v4449_v57 = vand.u32 4294901760, %v3280_v29  ;;  %v3336_v61 = vsub.f32 %v28_v25, %v84_v37 }
   0xd   :  { %v297_v60 = vand.u32 4294901760, %v296_v50  ;;  %v185_v62 = vand.u32 4294901760, %v184_v51  ;;  %v192_v63 = vand.u32 4294901760, %v191_v52 }
   0xe   :  { %10 = vsyncpa [#allocation3], 0  ;;  %v304_v0 = vand.u32 4294901760, %v303_v54  ;;  %v3338_v1 = vpack.c.bf16 %v138_v55, %v135_v53  ;;  %v3340_v2 = vsub.f32 %v45_v40, %v135_v53  ;;  %v310_v3 = vsub.f32 %v3278_v28, %v4452_v56  ;;  %v47_v8 = vld [vmem:[%s4435_s2 + $0xc0] sm:$0xff]  ;;  %v48_v9 = vld [vmem:[%s4435_s2 + $0xc8] sm:$0xff] }
   0xf   :  { %2778 = vmatpush3.bf16.msra.mxu0 %v3310_v48  ;;  %v2801_v4 = vpack.c.bf16 %v192_v63, %v185_v62  ;;  %v317_v5 = vsub.f32 %v3280_v29, %v4449_v57  ;;  %v87_v6 = vand.u32 4294901760, %v29_v58  ;;  %v90_v7 = vand.u32 4294901760, %v30_v59  ;;  %v31_v17 = vld [vmem:[%s4435_s2 + $0x40] sm:$0xff]  ;;  %v32_v36 = vld [vmem:[%s4435_s2 + $0x48] sm:$0xff]  ;;  %v50_v63 = vld [vmem:[%s4435_s2 + $0xd8] sm:$0xff] }
  0x10   :  { %v2799_v10 = vpack.c.bf16 %v304_v0, %v297_v60  ;;  %2780 = vmatprep.subr.bf16.mxu0 %v3338_v1  ;;  %v311_v11 = vand.u32 4294901760, %v310_v3  ;;  %v4447_v12 = vand.u32 4294901760, %v3284_v31  ;;  %v4446_v13 = vand.u32 4294901760, %v3297_v41 }
  0x11   :  { %v3361_v18 = vsub.f32 %v46_v45, %v138_v55  ;;  %v318_v19 = vand.u32 4294901760, %v317_v5  ;;  %v3363_v20 = vpack.c.bf16 %v90_v7, %v87_v6  ;;  %v3365_v24 = vsub.f32 %v29_v58, %v87_v6  ;;  %v33_v6 = vld [vmem:[%s4435_s2 + $0x50] sm:$0xff] }
  0x12   :  { %2800 = vmatprep.subr.bf16.mxu1 %v2799_v10  ;;  %v198_v25 = vsub.f32 %v3284_v31, %v4447_v12  ;;  %v205_v26 = vsub.f32 %v3297_v41, %v4446_v13  ;;  %v141_v32 = vand.u32 4294901760, %v47_v8  ;;  %v144_v33 = vand.u32 4294901760, %v48_v9 }
  0x13   :  { %2802 = vmatpush3.bf16.msra.mxu1 %v2801_v4  ;;  %v2803_v37 = vpack.c.bf16 %v318_v19, %v311_v11  ;;  %2782 = vmatpush3.bf16.msra.mxu0 %v3363_v20  ;;  %v4444_v40 = vand.u32 4294901760, %v3301_v43  ;;  %v4443_v45 = vand.u32 4294901760, %v3307_v46  ;;  %v93_v50 = vand.u32 4294901760, %v31_v17 }
  0x14   :  { %v3379_v51 = vsub.f32 %v30_v59, %v90_v7  ;;  %v199_v52 = vand.u32 4294901760, %v198_v25  ;;  %v206_v53 = vand.u32 4294901760, %v205_v26  ;;  %v3381_v54 = vpack.c.bf16 %v144_v33, %v141_v32  ;;  %v49_v59 = vld [vmem:[%s4435_s2 + $0xd0] sm:$0xff] }
  0x15   :  { %2804 = vmatprep.subr.bf16.mxu1 %v2803_v37  ;;  %v3383_v55 = vsub.f32 %v47_v8, %v141_v32  ;;  %v324_v58 = vsub.f32 %v3301_v43, %v4444_v40  ;;  %v331_v60 = vsub.f32 %v3307_v46, %v4443_v45  ;;  %v96_v62 = vand.u32 4294901760, %v32_v36  ;;  %v34_v32 = vld [vmem:[%s4435_s2 + $0x58] sm:$0xff] }
  0x16   :  { %v2805_v0 = vpack.c.bf16 %v206_v53, %v199_v52  ;;  %2784 = vmatprep.subr.bf16.mxu0 %v3381_v54  ;;  %v3398_v3 = vsub.f32 %v48_v9, %v144_v33  ;;  %v4442_v4 = vand.u32 4294901760, %v3312_v49  ;;  %v4439_v5 = vand.u32 4294901760, %v3336_v61 }
  0x17   :  { %v325_v7 = vand.u32 4294901760, %v324_v58  ;;  %v332_v8 = vand.u32 4294901760, %v331_v60  ;;  %v3405_v10 = vpack.c.bf16 %v96_v62, %v93_v50  ;;  %v3407_v11 = vsub.f32 %v31_v17, %v93_v50 }
  0x18   :  { %2806 = vmatpush3.bf16.msra.mxu1 %v2805_v0  ;;  %v212_v9 = vsub.f32 %v3312_v49, %v4442_v4  ;;  %v219_v19 = vsub.f32 %v3336_v61, %v4439_v5  ;;  %v147_v25 = vand.u32 4294901760, %v49_v59  ;;  %v150_v26 = vand.u32 4294901760, %v50_v63 }
  0x19   :  { %v2807_v33 = vpack.c.bf16 %v332_v8, %v325_v7  ;;  %2786 = vmatpush3.bf16.msra.mxu0 %v3405_v10  ;;  %v4441_v17 = vand.u32 4294901760, %v3340_v2  ;;  %v4440_v37 = vand.u32 4294901760, %v3361_v18  ;;  %v99_v50 = vand.u32 4294901760, %v33_v6 }
  0x1a   :  { %v3421_v52 = vsub.f32 %v32_v36, %v96_v62  ;;  %v213_v53 = vand.u32 4294901760, %v212_v9  ;;  %v220_v58 = vand.u32 4294901760, %v219_v19  ;;  %v3423_v60 = vpack.c.bf16 %v150_v26, %v147_v25  ;;  %v51_v36 = vld [vmem:[%s4435_s2 + $0xe0] sm:$0xff]  ;;  %v52_v62 = vld [vmem:[%s4435_s2 + $0xe8] sm:$0xff] }
  0x1b   :  { %2808 = vmatprep.subr.bf16.mxu1 %v2807_v33  ;;  %v3425_v0 = vsub.f32 %v49_v59, %v147_v25  ;;  %v338_v7 = vsub.f32 %v3340_v2, %v4441_v17  ;;  %v345_v8 = vsub.f32 %v3361_v18, %v4440_v37  ;;  %v102_v5 = vand.u32 4294901760, %v34_v32  ;;  %v35_v33 = vld [vmem:[%s4435_s2 + $0x60] sm:$0xff] }
  0x1c   :  { %v2809_v9 = vpack.c.bf16 %v220_v58, %v213_v53  ;;  %2788 = vmatprep.subr.bf16.mxu0 %v3423_v60  ;;  %v3440_v59 = vsub.f32 %v50_v63, %v150_v26  ;;  %v4445_v19 = vand.u32 4294901760, %v3365_v24  ;;  %v4448_v25 = vand.u32 4294901760, %v3379_v51 }
  0x1d   :  { %v339_v37 = vand.u32 4294901760, %v338_v7  ;;  %v346_v17 = vand.u32 4294901760, %v345_v8  ;;  %v3447_v4 = vpack.c.bf16 %v102_v5, %v99_v50  ;;  %v3449_v45 = vsub.f32 %v33_v6, %v99_v50  ;;  %v36_v7 = vld [vmem:[%s4435_s2 + $0x68] sm:$0xff] }
  0x1e   :  { %2810 = vmatpush3.bf16.msra.mxu1 %v2809_v9  ;;  %v226_v63 = vsub.f32 %v3365_v24, %v4445_v19  ;;  %v233_v26 = vsub.f32 %v3379_v51, %v4448_v25  ;;  %v153_v53 = vand.u32 4294901760, %v51_v36  ;;  %v156_v58 = vand.u32 4294901760, %v52_v62 }
  0x1f   :  { %4532 = vst [vmem:[#allocation5_spill] sm:$0xff] %v3447_v4  ;;  %v2811_v8 = vpack.c.bf16 %v346_v17, %v339_v37  ;;  %2790 = vmatpush3.bf16.msra.mxu0 %v3447_v4  ;;  %v4451_v6 = vand.u32 4294901760, %v3383_v55  ;;  %v4450_v50 = vand.u32 4294901760, %v3398_v3  ;;  %v105_v9 = vand.u32 4294901760, %v35_v33 }
  0x20   :  { %v3463_v40 = vsub.f32 %v34_v32, %v102_v5  ;;  %v227_v19 = vand.u32 4294901760, %v226_v63  ;;  %v234_v13 = vand.u32 4294901760, %v233_v26  ;;  %v3465_v12 = vpack.c.bf16 %v156_v58, %v153_v53  ;;  %v53_v5 = vld [vmem:[%s4435_s2 + $0xf0] sm:$0xff]  ;;  %v54_v32 = vld [vmem:[%s4435_s2 + $0xf8] sm:$0xff] }
  0x21   :  { %2812 = vmatprep.subr.bf16.mxu1 %v2811_v8  ;;  %v3467_v25 = vsub.f32 %v51_v36, %v153_v53  ;;  %v352_v17 = vsub.f32 %v3383_v55, %v4451_v6  ;;  %v359_v37 = vsub.f32 %v3398_v3, %v4450_v50  ;;  %v108_v57 = vand.u32 4294901760, %v36_v7  ;;  %v37_v8 = vld [vmem:[%s4435_s2 + $0x70] sm:$0xff] }
  0x22   :  { %4533 = vst [vmem:[#allocation6_spill] sm:$0xff] %v3465_v12  ;;  %v2813_v63 = vpack.c.bf16 %v234_v13, %v227_v19  ;;  %2792 = vmatprep.subr.bf16.mxu0 %v3465_v12  ;;  %v3482_v36 = vsub.f32 %v52_v62, %v156_v58  ;;  %v4455_v26 = vand.u32 4294901760, %v3407_v11  ;;  %v4458_v53 = vand.u32 4294901760, %v3421_v52 }
  0x23   :  { %v353_v50 = vand.u32 4294901760, %v352_v17  ;;  %v360_v6 = vand.u32 4294901760, %v359_v37  ;;  %v3489_v56 = vpack.c.bf16 %v108_v57, %v105_v9  ;;  %v3491_v39 = vsub.f32 %v35_v33, %v105_v9  ;;  %v38_v17 = vld [vmem:[%s4435_s2 + $0x78] sm:$0xff] }
  0x24   :  { %2814 = vmatpush3.bf16.msra.mxu1 %v2813_v63  ;;  %v240_v13 = vsub.f32 %v3407_v11, %v4455_v26  ;;  %v247_v62 = vsub.f32 %v3421_v52, %v4458_v53  ;;  %v159_v19 = vand.u32 4294901760, %v53_v5  ;;  %v162_v58 = vand.u32 4294901760, %v54_v32 }
  0x25   :  { %4534 = vst [vmem:[#allocation7_spill] sm:$0xff] %v3489_v56  ;;  %v2815_v37 = vpack.c.bf16 %v360_v6, %v353_v50  ;;  %2794 = vmatpush3.bf16.msra.mxu0 %v3489_v56  ;;  %v4462_v33 = vand.u32 4294901760, %v3425_v0  ;;  %v4461_v9 = vand.u32 4294901760, %v3440_v59  ;;  %v111_v63 = vand.u32 4294901760, %v37_v8 }
  0x26   :  { %v3505_v38 = vsub.f32 %v36_v7, %v108_v57  ;;  %v241_v26 = vand.u32 4294901760, %v240_v13  ;;  %v248_v47 = vand.u32 4294901760, %v247_v62  ;;  %v3507_v44 = vpack.c.bf16 %v162_v58, %v159_v19 }
  0x27   :  { %2816 = vmatprep.subr.bf16.mxu1 %v2815_v37  ;;  %v3509_v53 = vsub.f32 %v53_v5, %v159_v19  ;;  %v366_v6 = vsub.f32 %v3425_v0, %v4462_v33  ;;  %v373_v50 = vsub.f32 %v3440_v59, %v4461_v9  ;;  %v114_v14 = vand.u32 4294901760, %v38_v17 }
  0x28   :  { %4535 = vst [vmem:[#allocation8_spill] sm:$0xff] %v3505_v38  ;;  %4536 = vst [vmem:[#allocation9_spill] sm:$0xff] %v3507_v44  ;;  %v2817_v56 = vpack.c.bf16 %v248_v47, %v241_v26  ;;  %2796 = vmatprep.subr.bf16.mxu0 %v3507_v44  ;;  %v3518_v57 = vsub.f32 %v54_v32, %v162_v58  ;;  %v4464_v7 = vand.u32 4294901760, %v3449_v45  ;;  %v4463_v13 = vand.u32 4294901760, %v3463_v40 }
  0x29   :  { %v367_v5 = vand.u32 4294901760, %v366_v6  ;;  %v374_v62 = vand.u32 4294901760, %v373_v50  ;;  %v3522_v19 = vpack.c.bf16 %v114_v14, %v111_v63  ;;  %v3524_v37 = vsub.f32 %v37_v8, %v111_v63  ;;  %v3170_v8 = vld.sshfl [vmem:[%s4433_s0] sm:$0x33 pattern:$0x76325410] }
  0x2a   :  { %4537 = vst [vmem:[#allocation10_spill] sm:$0xff] %v3518_v57  ;;  %2818 = vmatpush3.bf16.msra.mxu1 %v2817_v56  ;;  %v254_v9 = vsub.f32 %v3449_v45, %v4464_v7  ;;  %v261_v47 = vsub.f32 %v3463_v40, %v4463_v13  ;;  %v60_v32 = vunpack.c.0.s8 %v3275_v27  ;;  %v4540_v26 = vlaneseq }
  0x2b   :  { %4538 = vst [vmem:[#allocation11_spill] sm:$0xff] %v3522_v19  ;;  %4539 = vst [vmem:[#allocation12_spill] sm:$0xff] %v3524_v37  ;;  %v2819_v33 = vpack.c.bf16 %v374_v62, %v367_v5  ;;  %2798 = vmatpush3.bf16.msra.mxu0 %v3522_v19  ;;  %v4467_v56 = vand.u32 4294901760, %v3467_v25  ;;  %v4469_v63 = vand.u32 4294901760, %v3482_v36  ;;  %v2831_v6 = vpack.c.bf16 %v3289_v35, %v3287_v34 }
  0x2c   :  { %v62_v58 = vshrl.u32 %v4540_v26, 7  ;;  %v255_v50 = vand.u32 4294901760, %v254_v9  ;;  %v262_v13 = vand.u32 4294901760, %v261_v47  ;;  %v4472_v27 = vand.u32 4294901760, %v3491_v39 }
  0x2d   :  { %2820 = vmatprep.subr.bf16.mxu1 %v2819_v33  ;;  %v3545_v5 = vsub.f32 %v38_v17, %v114_v14  ;;  %v380_v62 = vsub.f32 %v3467_v25, %v4467_v56  ;;  %v387_v26 = vsub.f32 %v3482_v36, %v4469_v63  ;;  %2832 = vmatprep.subr.bf16.mxu0 %v2831_v6  ;;  %v274_v19 = vand.u32 4294901760, %v3505_v38 }
  0x2e   :  { %v3542_v7 = vsub.s32 %v60_v32, %v62_v58  ;;  %v2821_v9 = vpack.c.bf16 %v262_v13, %v255_v50  ;;  %v268_v47 = vsub.f32 %v3491_v39, %v4472_v27  ;;  %v393_v33 = vand.u32 4294901760, %v3509_v53 }
  0x2f   :  { %4542 = vst [vmem:[#allocation14_spill] sm:$0xff] %v3545_v5  ;;  %v381_v14 = vand.u32 4294901760, %v380_v62  ;;  %v388_v17 = vand.u32 4294901760, %v387_v26  ;;  %v275_v32 = vsub.f32 %v3505_v38, %v274_v19  ;;  %v400_v58 = vand.u32 4294901760, %v3518_v57 }
  0x30   :  { %4541 = vst [vmem:[#allocation13_spill] sm:$0xff] %v3542_v7  ;;  %2822 = vmatpush3.bf16.msra.mxu1 %v2821_v9  ;;  %v65_v56 = vcombine.high %v3170_v8, %v3170_v8  ;;  %v3560_v7 = vand.u32 4294901760, %v3170_v8  ;;  %v269_v6 = vand.u32 4294901760, %v268_v47  ;;  %v394_v63 = vsub.f32 %v3509_v53, %v393_v33 }
  0x31   :  { %v2823_v13 = vpack.c.bf16 %v388_v17, %v381_v14  ;;  %v276_v50 = vand.u32 4294901760, %v275_v32  ;;  %v401_v44 = vsub.f32 %v3518_v57, %v400_v58  ;;  %v281_v12 = vand.u32 4294901760, %v3524_v37 }
  0x32   :  { %v3564_v27 = vand.u32 4294901760, %v65_v56  ;;  %v3567_v62 = vsub.f32 %v3170_v8, %v3560_v7  ;;  %v395_v26 = vand.u32 4294901760, %v394_v63  ;;  %v288_v38 = vand.u32 4294901760, %v3545_v5 }
  0x33   :  { %2824 = vmatprep.subr.bf16.mxu1 %v2823_v13  ;;  %v2825_v9 = vpack.c.bf16 %v276_v50, %v269_v6  ;;  %v402_v4 = vand.u32 4294901760, %v401_v44  ;;  %v282_v17 = vsub.f32 %v3524_v37, %v281_v12  ;;  %v2833_v57 = vpack.c.bf16 %v3265_v22, %v3255_v16 }
  0x34   :  { %4543 = vst [vmem:[#allocation15_spill] sm:$0xff] %v3564_v27  ;;  %4544 = vst [vmem:[#allocation16_spill] sm:$0xff] %v3567_v62  ;;  %v165_v47 = vsub.f32 %v65_v56, %v3564_v27  ;;  %v4483_v14 = vand.u32 4294901760, %v3567_v62  ;;  %405 = vmatprep.mubr.f32.mxu1 %v3564_v27  ;;  %v289_v8 = vsub.f32 %v3545_v5, %v288_v38  ;;  %v4546_v5 = vand.u32 4294901760, %v3289_v35 }
  0x35   :  { %2826 = vmatpush3.bf16.msra.mxu1 %v2825_v9  ;;  %v2827_v32 = vpack.c.bf16 %v402_v4, %v395_v26  ;;  %v283_v44 = vand.u32 4294901760, %v282_v17  ;;  %v2835_v27 = vpack.c.bf16 %v3280_v29, %v3278_v28  ;;  %v4545_v26 = vand.u32 4294901760, %v3287_v34 }
  0x36   :  { %v166_v63 = vand.u32 4294901760, %v165_v47  ;;  %v173_v6 = vsub.f32 %v3567_v62, %v4483_v14  ;;  %v290_v13 = vand.u32 4294901760, %v289_v8  ;;  %v4547_v17 = vand.u32 4294901760, %v3255_v16 }
  0x37   :  { %2828 = vmatprep.subr.bf16.mxu1 %v2827_v32  ;;  %v3587_v37 = vpack.c.bf16 %v4546_v5, %v4545_v26  ;;  %v4548_v32 = vand.u32 4294901760, %v3265_v22  ;;  %v4550_v14 = vand.u32 4294901760, %v3280_v29  ;;  %v4552_v34 = vand.u32 4294901760, %v3297_v41 }
  0x38   :  { %v167_v50 = vsub.f32 %v165_v47, %v166_v63  ;;  %v174_v56 = vand.u32 4294901760, %v173_v6  ;;  %v2829_v9 = vpack.c.bf16 %v290_v13, %v283_v44  ;;  %v4549_v6 = vand.u32 4294901760, %v3278_v28 }
  0x39   :  { %v3593_v8 = vpack.c.bf16 %v4548_v32, %v4547_v17  ;;  %v4551_v44 = vand.u32 4294901760, %v3284_v31  ;;  %v4553_v5 = vand.u32 4294901760, %v3301_v43  ;;  %v4554_v16 = vand.u32 4294901760, %v3307_v46 }
  0x3a   :  { %v168_v4 = vand.u32 4294901760, %v167_v50  ;;  %v3599_v62 = vpack.c.bf16 %v4550_v14, %v4549_v6  ;;  %2830 = vmatpush3.bf16.msra.mxu1 %v2829_v9  ;;  %v4555_v13 = vand.u32 4294901760, %v3312_v49  ;;  %v4556_v28 = vand.u32 4294901760, %v3336_v61 }
  0x3b   :  { %v3605_v35 = vpack.c.bf16 %v4552_v34, %v4551_v44  ;;  %v3611_v22 = vpack.c.bf16 %v4554_v16, %v4553_v5  ;;  %v4557_v14 = vand.u32 4294901760, %v3340_v2  ;;  %v4558_v50 = vand.u32 4294901760, %v3361_v18  ;;  %2864 = vmatprep.subr.bf16.mxu1 %v3253_v15 }
  0x3c   :  { %v3617_v29 = vpack.c.bf16 %v4556_v28, %v4555_v13  ;;  %169 = vmatprep.mubr.f32.mxu0 %v168_v4  ;;  %v4559_v26 = vand.u32 4294901760, %v3365_v24  ;;  %v4560_v17 = vand.u32 4294901760, %v3379_v51  ;;  %v4561_v6 = vand.u32 4294901760, %v3383_v55 }
  0x3d   :  { %v3623_v9 = vpack.c.bf16 %v4558_v50, %v4557_v14  ;;  %v4562_v44 = vand.u32 4294901760, %v3398_v3  ;;  %v4564_v5 = vand.u32 4294901760, %v3407_v11  ;;  %v4565_v16 = vand.u32 4294901760, %v3421_v52  ;;  %175 = vmatmul.mubr.f32.vlgmr.msra.gmra.mrb[0].mxu0 %v174_v56  ;;  %407 = vmatmul.mubr.f32.vlgmr.msra.gmra.mrb[0].mxu1 %v3560_v7 }
  0x3e   :  { %v3630_v32 = vpack.c.bf16 %v4560_v17, %v4559_v26  ;;  %v4566_v4 = vand.u32 4294901760, %v3425_v0  ;;  %v4567_v28 = vand.u32 4294901760, %v3440_v59  ;;  %v4568_v50 = vand.u32 4294901760, %v3449_v45  ;;  %2834 = vmatpush3.bf16.msra.mxu0 %v2833_v57  ;;  %2866 = vmatpush3.bf16.msra.mxu1 %v3263_v21 }
  0x3f   :  { %v3636_v34 = vpack.c.bf16 %v4562_v44, %v4561_v6  ;;  %v3642_v13 = vpack.c.bf16 %v4565_v16, %v4564_v5  ;;  %v4569_v26 = vand.u32 4294901760, %v3463_v40  ;;  %v4570_v6 = vand.u32 4294901760, %v3467_v25  ;;  %2836 = vmatprep.subr.bf16.mxu0 %v2835_v27  ;;  %2868 = vmatprep.subr.bf16.mxu1 %v3267_v23 }
  0x40   :  { %v3648_v14 = vpack.c.bf16 %v4567_v28, %v4566_v4  ;;  %v4571_v44 = vand.u32 4294901760, %v3482_v36  ;;  %v4572_v56 = vand.u32 4294901760, %v3491_v39  ;;  %v2837_v16 = vpack.c.bf16 %v3297_v41, %v3284_v31  ;;  %542 = vmatprep.mubr.f32.mxu0 %v165_v47  ;;  %649 = vmatprep.mubr.f32.mxu1 %v166_v63 }
  0x41   :  { %4563 = vst [vmem:[#allocation17_spill] sm:$0xff] %v3636_v34  ;;  %v3654_v17 = vpack.c.bf16 %v4569_v26, %v4568_v50  ;;  %v3669_v4 = vpack.c.bf16 %v400_v58, %v393_v33  ;;  %v3671_v28 = vpack.c.bf16 %v288_v38, %v281_v12  ;;  %v2839_v50 = vpack.c.bf16 %v3307_v46, %v3301_v43  ;;  %v4573_v12 = vld [vmem:[#allocation8_spill] sm:$0xff] }
  0x42   :  { %v3660_v34 = vpack.c.bf16 %v4571_v44, %v4570_v6  ;;  %v3664_v5 = vpack.c.bf16 %v274_v19, %v4572_v56  ;;  %2838 = vmatpush3.bf16.msra.mxu0 %v2837_v16  ;;  %v2841_v31 = vpack.c.bf16 %v3336_v61, %v3312_v49  ;;  %v2843_v41 = vpack.c.bf16 %v3361_v18, %v3340_v2 }
  0x43   :  { %2840 = vmatprep.subr.bf16.mxu0 %v2839_v50  ;;  %2870 = vmatpush3.bf16.msra.mxu1 %v3282_v30  ;;  %v2845_v38 = vpack.c.bf16 %v3379_v51, %v3365_v24  ;;  %v2847_v43 = vpack.c.bf16 %v3398_v3, %v3383_v55  ;;  %v2849_v46 = vpack.c.bf16 %v3421_v52, %v3407_v11  ;;  %v4574_v24 = vld [vmem:[#allocation10_spill] sm:$0xff]  ;;  %v4575_v55 = vld [vmem:[#allocation5_spill] sm:$0xff]  ;;  %v4579_v52 = vld [vmem:[#allocation7_spill] sm:$0xff]  ;;  %vm930_vm1 = vcmask 58368  }
  0x44   :  { %2872 = vmatprep.subr.bf16.mxu1 %v3299_v42  ;;  %v2851_v49 = vpack.c.bf16 %v3440_v59, %v3425_v0  ;;  %v2853_v61 = vpack.c.bf16 %v3463_v40, %v3449_v45  ;;  %v2855_v2 = vpack.c.bf16 %v3482_v36, %v3467_v25  ;;  %v2857_v18 = vpack.c.bf16 %v4573_v12, %v3491_v39  ;;  %v4576_v3 = vld [vmem:[#allocation6_spill] sm:$0xff]  ;;  %v4577_v40 = vld [vmem:[#allocation12_spill] sm:$0xff]  ;;  %v4580_v0 = vld [vmem:[#allocation9_spill] sm:$0xff] }
  0x45   :  { %v2859_v51 = vpack.c.bf16 %v4574_v24, %v3509_v53  ;;  %v4578_v45 = vld [vmem:[#allocation14_spill] sm:$0xff]  ;;  %v4581_v39 = vld [vmem:[#allocation11_spill] sm:$0xff]  ;;  %v4582_v59 = vld [vmem:[#allocation16_spill] sm:$0xff]  ;;  %v3197_v6 = vmov 0.0   ;;  %vm942_vm2 = vcmask 64512   ;;  %vm2331_vm3 = vcmask 254976  }
  0x46   :  { %2842 = vmatpush3.bf16.msra.mxu0 %v2841_v31  ;;  %v2861_v11 = vpack.c.bf16 %v4578_v45, %v4577_v40  ;;  %v4583_v25 = vand.u32 4294901760, %v4582_v59  ;;  %v4584_v36 = vld [vmem:[#allocation15_spill] sm:$0xff]  ;;  %v3779_v40 = vld [vmem:[%s4437_s4] sm:$0xff] }
  0x47   :  { %2844 = vmatprep.subr.bf16.mxu0 %v2843_v41  ;;  %2874 = vmatpush3.bf16.msra.mxu1 %v3310_v48 }
  0x48   :  { %2876 = vmatprep.subr.bf16.mxu1 %v3338_v1 }
  0x4a   :  { %2846 = vmatpush3.bf16.msra.mxu0 %v2845_v38 }
  0x4b   :  { %2848 = vmatprep.subr.bf16.mxu0 %v2847_v43  ;;  %2878 = vmatpush3.bf16.msra.mxu1 %v3363_v20 }
  0x4c   :  { %2880 = vmatprep.subr.bf16.mxu1 %v3381_v54 }
  0x4e   :  { %2850 = vmatpush3.bf16.msra.mxu0 %v2849_v46 }
  0x4f   :  { %2852 = vmatprep.subr.bf16.mxu0 %v2851_v49  ;;  %2882 = vmatpush3.bf16.msra.mxu1 %v3405_v10 }
  0x50   :  { %2884 = vmatprep.subr.bf16.mxu1 %v3423_v60 }
  0x52   :  { %2854 = vmatpush3.bf16.msra.mxu0 %v2853_v61 }
  0x53   :  { %2856 = vmatprep.subr.bf16.mxu0 %v2855_v2  ;;  %2886 = vmatpush3.bf16.msra.mxu1 %v4575_v55 }
  0x54   :  { %2888 = vmatprep.subr.bf16.mxu1 %v4576_v3 }
  0x56   :  { %2858 = vmatpush3.bf16.msra.mxu0 %v2857_v18 }
  0x57   :  { %2860 = vmatprep.subr.bf16.mxu0 %v2859_v51  ;;  %2890 = vmatpush3.bf16.msra.mxu1 %v4579_v52 }
  0x58   :  { %2892 = vmatprep.subr.bf16.mxu1 %v4580_v0 }
  0x5a   :  { %2862 = vmatpush3.bf16.msra.mxu0 %v2861_v11 }
  0x5b   :  { %2896 = vmatprep.subr.bf16.mxu0 %v3587_v37  ;;  %2894 = vmatpush3.bf16.msra.mxu1 %v4581_v39 }
  0x5c   :  { %2928 = vmatprep.subr.bf16.mxu1 %v3253_v15  ;;  %v4585_v15 = vld [vmem:[#allocation17_spill] sm:$0xff] }
  0x5d   :  { %545 = vmatmul.mubr.f32.vlgmr.msra.gmra.mrb[2].mxu0 %v4582_v59  ;;  %v3794_v59 = vld [vmem:[%s4437_s4 + $0x98] sm:$0xff] }
  0x5e   :  { %2898 = vmatpush3.bf16.msra.mxu0 %v3593_v8  ;;  %653 = vmatmul.mubr.f32.vlgmr.msra.gmra.mrb[2].mxu1 %v4583_v25 }
  0x5f   :  { %2900 = vmatprep.subr.bf16.mxu0 %v3599_v62  ;;  %2930 = vmatpush3.bf16.msra.mxu1 %v3263_v21  ;;  %v22_v21 = vld [vmem:[%s4434_s1] sm:$0x3] }
  0x60   :  { %2932 = vmatprep.subr.bf16.mxu1 %v3267_v23  ;;  %819 = vmatprep.mubr.f32.mxu0 %v4584_v36  ;;  %vm55_vm0 = vcmp.gt.f32.partialorder %v22_v21, 0.0  ;;  %v3801_v21 = vld [vmem:[%s4437_s4 + $0x10] sm:$0xff] }
  0x61   :  { %923 = vmatprep.mubr.f32.mxu1 %v4584_v36 }
  0x62   :  { %2902 = vmatpush3.bf16.msra.mxu0 %v3605_v35 }
  0x63   :  { %2904 = vmatprep.subr.bf16.mxu0 %v3611_v22  ;;  %2934 = vmatpush3.bf16.msra.mxu1 %v3282_v30  ;;  %v3196_v30 = vmov -10000.0  }
  0x64   :  { %2936 = vmatprep.subr.bf16.mxu1 %v3299_v42  ;;  %v56_v42 = vsel %vm55_vm0, 0.0, %v3196_v30 }
  0x66   :  { %2906 = vmatpush3.bf16.msra.mxu0 %v3617_v29 }
  0x67   :  { %2908 = vmatprep.subr.bf16.mxu0 %v3623_v9  ;;  %2938 = vmatpush3.bf16.msra.mxu1 %v3310_v48 }
  0x68   :  { %2940 = vmatprep.subr.bf16.mxu1 %v3338_v1 }
  0x6a   :  { %2910 = vmatpush3.bf16.msra.mxu0 %v3630_v32 }
  0x6b   :  { %2912 = vmatprep.subr.bf16.mxu0 %v4585_v15  ;;  %2942 = vmatpush3.bf16.msra.mxu1 %v3363_v20  ;;  %v1524_v15 = vand.u32 4294901760, %v3794_v59 }
  0x6c   :  { %2944 = vmatprep.subr.bf16.mxu1 %v3381_v54 }
  0x6e   :  { %2914 = vmatpush3.bf16.msra.mxu0 %v3642_v13  ;;  %v941_v13 = vld [vmem:[%s4436_s3 + $0x8] sm:$0xff] }
  0x6f   :  { %2916 = vmatprep.subr.bf16.mxu0 %v3648_v14  ;;  %2946 = vmatpush3.bf16.msra.mxu1 %v3405_v10  ;;  %v940_v14 = vld [vmem:[%s4436_s3] sm:$0xff]  ;;  %v946_v26 = vand.u32 4294901760, %v941_v13 }
  0x70   :  { %2948 = vmatprep.subr.bf16.mxu1 %v3423_v60 }
  0x71   :  { %v1025_v44 = vsub.f32 %v941_v13, %v946_v26 }
  0x72   :  { %2918 = vmatpush3.bf16.msra.mxu0 %v3654_v17  ;;  %v948_v17 = vand.u32 4294901760, %v940_v14 }
  0x73   :  { %2920 = vmatprep.subr.bf16.mxu0 %v3660_v34  ;;  %2950 = vmatpush3.bf16.msra.mxu1 %v4575_v55  ;;  %v1026_v56 = vand.u32 4294901760, %v1025_v44  ;;  %v1439_v55 = vld [vmem:[%s4437_s4 + $0x80] sm:$0xff] }
  0x74   :  { %2952 = vmatprep.subr.bf16.mxu1 %v4576_v3  ;;  %v1031_v31 = vsub.f32 %v940_v14, %v948_v17  ;;  %v1440_v3 = vld [vmem:[%s4437_s4 + $0x88] sm:$0xff]  ;;  %v1515_v45 = vand.u32 4294901760, %v1439_v55 }
  0x75   :  { %v1518_v11 = vand.u32 4294901760, %v1440_v3 }
  0x76   :  { %2922 = vmatpush3.bf16.msra.mxu0 %v3664_v5  ;;  %v1027_v5 = vsub.f32 %v1025_v44, %v1026_v56  ;;  %v1032_v46 = vand.u32 4294901760, %v1031_v31  ;;  %v3808_v30 = vsub.f32 %v1439_v55, %v1515_v45 }
  0x77   :  { %2924 = vmatprep.subr.bf16.mxu0 %v3669_v4  ;;  %2954 = vmatpush3.bf16.msra.mxu1 %v4579_v52  ;;  %v1424_v52 = vld [vmem:[%s4437_s4 + $0x8] sm:$0xff] }
  0x78   :  { %2956 = vmatprep.subr.bf16.mxu1 %v4580_v0  ;;  %v1028_v16 = vand.u32 4294901760, %v1027_v5  ;;  %v1033_v2 = vsub.f32 %v1031_v31, %v1032_v46  ;;  %v1467_v0 = vand.u32 4294901760, %v3779_v40  ;;  %v1470_v25 = vand.u32 4294901760, %v1424_v52 }
  0x7a   :  { %2926 = vmatpush3.bf16.msra.mxu0 %v3671_v28  ;;  %v1034_v24 = vand.u32 4294901760, %v1033_v2 }
  0x7b   :  { %2958 = vmatpush3.bf16.msra.mxu1 %v4581_v39  ;;  %1184 = vmatprep.subr.mxu0 %v946_v26  ;;  %v3789_v39 = vld [vmem:[%s4437_s4 + $0x90] sm:$0xff] }
  0x7c   :  { %947 = vmatprep.subr.mxu1 %v946_v26  ;;  %v1521_v36 = vand.u32 4294901760, %v3789_v39 }
  0x7d   :  { %821 = vmatmul.mubr.f32.vlgmr.msra.gmra.mrb[4].mxu0 %v3560_v7 }
  0x7e   :  { %925 = vmatmul.mubr.f32.vlgmr.msra.gmra.mrb[4].mxu1 %v3560_v7  ;;  %1249 = vmatprep.mubr.f32.mxu0 %v3197_v6 }
  0x7f   :  { %1012 = vmatprep.mubr.f32.mxu1 %v3197_v6  ;;  %1186 = vmatpush1.msra.mxu0 %v948_v17 }
  0x80   :  { %949 = vmatpush1.msra.mxu1 %v948_v17  ;;  %1262 = vmatprep.subr.mxu0 %v1026_v56 }
  0x81   :  { %1029 = vmatprep.subr.mxu1 %v1028_v16  ;;  %v3885_v16 = vld [vmem:[%s4437_s4 + $0x20] sm:$0xff] }
 0x110   :  { %v2379_v23 = vpop.f32.mrb[0].mxu0  ;;  %v2414_v1 = vpop.f32.mrb[0].mxu1 }
 0x111   :  { %v2380_v48 = vpop.f32.mrb[1].mxu0  ;;  %v2415_v54 = vpop.f32.mrb[1].mxu1 }
 0x112   :  { %v2381_v20 = vadd.f32 %v2380_v48, %v2379_v23  ;;  %v2416_v10 = vadd.f32 %v2415_v54, %v2414_v1  ;;  %v3806_v23 = vld [vmem:[%s4437_s4 + $0x18] sm:$0xff]  ;;  %v3813_v48 = vsub.f32 %v3779_v40, %v1467_v0  ;;  %v1473_v1 = vand.u32 4294901760, %v3801_v21 }
 0x113   :  { %v3821_v54 = vsub.f32 %v3789_v39, %v1521_v36 }
 0x114   :  { %v177_v60 = vadd.f32 %v2381_v20, %v56_v42  ;;  %v3810_v42 = vsub.f32 %v1440_v3, %v1518_v11  ;;  %v3816_v20 = vsub.f32 %v1424_v52, %v1470_v25 }
 0x116   :  { %v409_v53 = vadd.f32 %v2416_v10, %v177_v60  ;;  %v3826_v10 = vsub.f32 %v3794_v59, %v1524_v15  ;;  %v1476_v60 = vand.u32 4294901760, %v3806_v23 }
 0x118   :  { %v4032_v39 = vpack.c.bf16 %v1476_v60, %v1473_v1 }
 0x130   :  { %v2449_v57 = vpop.f32.mrb[2].mxu0 }
 0x131   :  { %v2450_v19 = vpop.f32.mrb[3].mxu0  ;;  %v2484_v37 = vpop.f32.mrb[2].mxu1 }
 0x132   :  { %v2451_v27 = vadd.f32 %v2450_v19, %v2449_v57  ;;  %v2485_v7 = vpop.f32.mrb[3].mxu1  ;;  %v4500_v57 = vand.u32 4294901760, %v3810_v42  ;;  %v4499_v19 = vand.u32 4294901760, %v3813_v48 }
 0x133   :  { %v2486_v33 = vadd.f32 %v2485_v7, %v2484_v37  ;;  %v3836_v37 = vsub.f32 %v3801_v21, %v1473_v1  ;;  %v4497_v7 = vand.u32 4294901760, %v3821_v54  ;;  %v4048_v21 = vld [vmem:[%s4437_s4 + $0xd0] sm:$0xff] }
 0x134   :  { %v547_v58 = vadd.f32 %v2451_v27, %v409_v53  ;;  %v4502_v53 = vand.u32 4294901760, %v3808_v30  ;;  %v4498_v27 = vand.u32 4294901760, %v3816_v20 }
 0x136   :  { %v655_v62 = vadd.f32 %v2486_v33, %v547_v58  ;;  %v4496_v33 = vand.u32 4294901760, %v3826_v10  ;;  %v3844_v58 = vsub.f32 %v3806_v23, %v1476_v60 }
 0x150   :  { %v2519_v47 = vpop.f32.mrb[4].mxu0 }
 0x151   :  { %v2520_v63 = vpop.f32.mrb[5].mxu0  ;;  %v2554_v8 = vpop.f32.mrb[4].mxu1 }
 0x152   :  { %v2521_v35 = vadd.f32 %v2520_v63, %v2519_v47  ;;  %v2555_v22 = vpop.f32.mrb[5].mxu1  ;;  %v1701_v47 = vsub.f32 %v3810_v42, %v4500_v57  ;;  %v1582_v63 = vsub.f32 %v3813_v48, %v4499_v19  ;;  %v4082_v19 = vld [vmem:[%s4437_s4 + $0x58] sm:$0xff] }
 0x153   :  { %v2556_v29 = vadd.f32 %v2555_v22, %v2554_v8  ;;  %v4491_v8 = vand.u32 4294901760, %v3836_v37  ;;  %v1708_v22 = vsub.f32 %v3821_v54, %v4497_v7 }
 0x154   :  { %v823_v9 = vadd.f32 %v2521_v35, %v655_v62  ;;  %v1694_v62 = vsub.f32 %v3808_v30, %v4502_v53  ;;  %v1589_v35 = vsub.f32 %v3816_v20, %v4498_v27  ;;  %v1702_v13 = vand.u32 4294901760, %v1701_v47  ;;  %v4077_v27 = vld [vmem:[%s4437_s4 + $0x50] sm:$0xff]  ;;  %v4097_v53 = vld [vmem:[%s4437_s4 + $0xe0] sm:$0xff] }
 0x155   :  { %v1583_v14 = vand.u32 4294901760, %v1582_v63 }
 0x156   :  { %v927_v32 = vadd.f32 %v2556_v29, %v823_v9  ;;  %v1715_v29 = vsub.f32 %v3826_v10, %v4496_v33  ;;  %v4490_v9 = vand.u32 4294901760, %v3844_v58 }
 0x158   :  { %v931_v34 = vsel %vm930_vm1, %v927_v32, -inf  ;;  %v1716_v56 = vand.u32 4294901760, %v1715_v29  ;;  %v1603_v5 = vsub.f32 %v3844_v58, %v4490_v9 }
 0x159   :  { %932 = vmax.xlane.f32.xlu0 %v931_v34  ;;  %v1695_v34 = vand.u32 4294901760, %v1694_v62 }
 0x1e6   :  { %v933_v4 = vpop.xlane.xlu0 %932 }
 0x1e7   :  { %v934_v28 = vsub.f32 %v927_v32, %v933_v4  ;;  %v3869_v32 = vld [vmem:[%s4437_s4 + $0xa0] sm:$0xff]  ;;  %v3890_v4 = vld [vmem:[%s4437_s4 + $0x28] sm:$0xff] }
 0x1e9   :  { %v935_v50 = vmul.f32 1.442695, %v934_v28  ;;  %v2991_v28 = vpack.c.bf16 %v1702_v13, %v1695_v34 }
 0x1eb   :  { %3165 = vpow2.f32 %v935_v50 }
 0x1f5   :  { %v3166_v41 = vpop.eup %3165 }
 0x1f6   :  { %v944_v38 = vsel %vm942_vm2, %v3166_v41, 0  ;;  %v937_v43 = vsel %vm930_vm1, %v3166_v41, 0.0  ;;  %v1527_v41 = vand.u32 4294901760, %v3869_v32 }
 0x1f7   :  { %v1013_v49 = vand.u32 4294901760, %v944_v38  ;;  %938 = vadd.xlane.f32.xlu0 %v937_v43 }
 0x1f8   :  { %v3901_v2 = vsub.f32 %v3869_v32, %v1527_v41 }
 0x1f9   :  { %v3764_v61 = vsub.f32 %v944_v38, %v1013_v49 }
 0x1fa   :  { %v4489_v55 = vand.u32 4294901760, %v3901_v2 }
 0x1fb   :  { %v1015_v12 = vand.u32 4294901760, %v3764_v61 }
 0x1fd   :  { %1253 = vmatmul.mubr.f32.vlgmr.msra.gmra.mrb[6].mxu0 %v1015_v12  ;;  %v1016_v18 = vsub.f32 %v3764_v61, %v1015_v12  ;;  %v3903_v12 = vpack.c.bf16 %v1470_v25, %v1467_v0 }
 0x1fe   :  { %1266 = vmatpush1.msra.mxu0 %v1032_v46  ;;  %1329 = vmatprep.mubr.f32.mxu0 %v3197_v6  ;;  %v1604_v46 = vand.u32 4294901760, %v1603_v5  ;;  %v3959_v5 = vld [vmem:[%s4437_s4 + $0x38] sm:$0xff] }
 0x1ff   :  { %v1017_v51 = vand.u32 4294901760, %v1016_v18  ;;  %1338 = vmatprep.subr.mxu0 %v946_v26  ;;  %v1596_v26 = vsub.f32 %v3836_v37, %v4491_v8  ;;  %v1479_v18 = vand.u32 4294901760, %v3885_v16 }
 0x201   :  { %1018 = vmatmul.mubr.f32.vlgmr.msra.gmra.mrb[6].mxu1 %v1017_v51  ;;  %v1597_v50 = vand.u32 4294901760, %v1596_v26  ;;  %v3917_v3 = vsub.f32 %v3885_v16, %v1479_v18  ;;  %v3947_v26 = vld [vmem:[%s4437_s4 + $0xb8] sm:$0xff] }
 0x202   :  { %1035 = vmatpush1.msra.mxu1 %v1034_v24  ;;  %1098 = vmatprep.mubr.f32.mxu1 %v3197_v6  ;;  %v1482_v24 = vand.u32 4294901760, %v3890_v4 }
 0x203   :  { %1108 = vmatprep.subr.mxu1 %v1025_v44  ;;  %v1709_v44 = vand.u32 4294901760, %v1708_v22  ;;  %v4487_v52 = vand.u32 4294901760, %v3917_v3 }
 0x204   :  { %v3922_v40 = vsub.f32 %v3890_v4, %v1482_v24 }
 0x205   :  { %1331 = vmatmul.mubr.f32.vlgmr.msra.gmra.mrb[6].mxu0 %v1013_v49  ;;  %v2995_v43 = vpack.c.bf16 %v1716_v56, %v1709_v44  ;;  %v1610_v47 = vsub.f32 %v3917_v3, %v4487_v52  ;;  %v1536_v44 = vand.u32 4294901760, %v3947_v26  ;;  %v3954_v56 = vld [vmem:[%s4437_s4 + $0x30] sm:$0xff] }
 0x206   :  { %1340 = vmatpush1.msra.mxu0 %v948_v17  ;;  %1403 = vmatprep.mubr.f32.mxu0 %v3197_v6  ;;  %v3877_v17 = vld [vmem:[%s4437_s4 + $0xa8] sm:$0xff]  ;;  %v4486_v0 = vand.u32 4294901760, %v3922_v40 }
 0x207   :  { %2992 = vmatprep.subr.bf16.mxu0 %v2991_v28  ;;  %v1611_v22 = vand.u32 4294901760, %v1610_v47  ;;  %v1485_v28 = vand.u32 4294901760, %v3954_v56 }
 0x208   :  { %v1617_v63 = vsub.f32 %v3922_v40, %v4486_v0 }
 0x209   :  { %1100 = vmatmul.mubr.f32.vlgmr.msra.gmra.mrb[6].mxu1 %v1013_v49 }
 0x20a   :  { %1111 = vmatpush1.msra.mxu1 %v1031_v31  ;;  %1174 = vmatprep.mubr.f32.mxu1 %v3197_v6  ;;  %v1590_v6 = vand.u32 4294901760, %v1589_v35  ;;  %v3892_v31 = vpack.c.bf16 %v1518_v11, %v1515_v45  ;;  %v1722_v11 = vsub.f32 %v3901_v2, %v4489_v55  ;;  %v1618_v29 = vand.u32 4294901760, %v1617_v63 }
 0x20c   :  { %v2993_v38 = vpack.c.bf16 %v1590_v6, %v1583_v14  ;;  %2960 = vmatprep.subr.bf16.mxu1 %v3892_v31  ;;  %v1723_v62 = vand.u32 4294901760, %v1722_v11  ;;  %v3001_v13 = vpack.c.bf16 %v1618_v29, %v1611_v22  ;;  %v3942_v14 = vld [vmem:[%s4437_s4 + $0xb0] sm:$0xff]  ;;  %v3986_v11 = vld [vmem:[%s4437_s4 + $0xc0] sm:$0xff]  ;;  %v4005_v29 = vld [vmem:[%s4437_s4 + $0x48] sm:$0xff] }
 0x20d   :  { %1405 = vmatmul.mubr.f32.vlgmr.msra.gmra.mrb[6].mxu0 %v1013_v49  ;;  %v1530_v49 = vand.u32 4294901760, %v3877_v17  ;;  %v1533_v6 = vand.u32 4294901760, %v3942_v14  ;;  %v4510_v63 = vand.u32 4294901760, %v3986_v11  ;;  %v4000_v22 = vld [vmem:[%s4437_s4 + $0x40] sm:$0xff]  ;;  %v4503_v52 = vand.u32 4294901760, %v4005_v29 }
 0x20e   :  { %2994 = vmatpush3.bf16.msra.mxu0 %v2993_v38  ;;  %v4508_v0 = vand.u32 4294901760, %v4000_v22 }
 0x20f   :  { %v3910_v51 = vsub.f32 %v3877_v17, %v1530_v49  ;;  %2996 = vmatprep.subr.bf16.mxu0 %v2995_v43  ;;  %v3966_v38 = vsub.f32 %v3942_v14, %v1533_v6  ;;  %v3971_v43 = vsub.f32 %v3947_v26, %v1536_v44  ;;  %v4026_v8 = vsub.f32 %v3986_v11, %v4510_v63 }
 0x210   :  { %v4062_v33 = vsub.f32 %v4005_v29, %v4503_v52  ;;  %v4589_v14 = vand.u32 4294901760, %v3959_v5 }
 0x211   :  { %1177 = vmatmul.mubr.f32.vlgmr.msra.gmra.mrb[6].mxu1 %v3764_v61  ;;  %v2997_v61 = vpack.c.bf16 %v1604_v46, %v1597_v50  ;;  %v4488_v45 = vand.u32 4294901760, %v3910_v51  ;;  %v4511_v50 = vand.u32 4294901760, %v3959_v5  ;;  %v3976_v46 = vsub.f32 %v3954_v56, %v1485_v28 }
 0x212   :  { %2962 = vmatpush3.bf16.msra.mxu1 %v3903_v12  ;;  %v4494_v47 = vand.u32 4294901760, %v3971_v43  ;;  %v4501_v60 = vand.u32 4294901760, %v4026_v8  ;;  %4586 = vst [vmem:[#allocation8_spill] sm:$0xff] %v4062_v33 }
 0x213   :  { %2998 = vmatpush3.bf16.msra.mxu0 %v2997_v61  ;;  %v1729_v25 = vsub.f32 %v3910_v51, %v4488_v45  ;;  %v3981_v61 = vsub.f32 %v3959_v5, %v4511_v50  ;;  %v4015_v45 = vpack.c.bf16 %v1524_v15, %v1521_v36  ;;  %v4590_v5 = vand.u32 4294901760, %v3986_v11 }
 0x214   :  { %v1743_v9 = vsub.f32 %v3971_v43, %v4494_v47  ;;  %v1750_v7 = vsub.f32 %v4026_v8, %v4501_v60  ;;  %v4506_v60 = vand.u32 4294901760, %v4062_v33 }
 0x215   :  { %v1730_v35 = vand.u32 4294901760, %v1729_v25  ;;  %v3991_v25 = vld [vmem:[%s4437_s4 + $0xc8] sm:$0xff]  ;;  %2964 = vmatprep.subr.bf16.mxu1 %v4015_v45 }
 0x216   :  { %v1744_v1 = vand.u32 4294901760, %v1743_v9  ;;  %2966 = vmatpush3.bf16.msra.mxu1 %v4032_v39  ;;  %v4067_v9 = vld [vmem:[%s4437_s4 + $0xd8] sm:$0xff]  ;;  %v1751_v52 = vand.u32 4294901760, %v1750_v7  ;;  %v1497_v7 = vand.u32 4294901760, %v4077_v27 }
 0x217   :  { %v2999_v34 = vpack.c.bf16 %v1730_v35, %v1723_v62  ;;  %v4495_v62 = vand.u32 4294901760, %v3966_v38  ;;  %v4509_v35 = vand.u32 4294901760, %v3991_v25  ;;  %v1548_v17 = vand.u32 4294901760, %v4067_v9 }
 0x219   :  { %3000 = vmatprep.subr.bf16.mxu0 %v2999_v34  ;;  %v4493_v34 = vand.u32 4294901760, %v3976_v46  ;;  %v1736_v55 = vsub.f32 %v3966_v38, %v4495_v62  ;;  %v4043_v15 = vsub.f32 %v3991_v25, %v4509_v35  ;;  %v4136_v35 = vsub.f32 %v4077_v27, %v1497_v7 }
 0x21a   :  { %3002 = vmatpush3.bf16.msra.mxu0 %v3001_v13  ;;  %v4492_v13 = vand.u32 4294901760, %v3981_v61 }
 0x21b   :  { %v1624_v59 = vsub.f32 %v3976_v46, %v4493_v34  ;;  %v1737_v23 = vand.u32 4294901760, %v1736_v55  ;;  %v4505_v62 = vand.u32 4294901760, %v4043_v15  ;;  %v4512_v4 = vand.u32 4294901760, %v4136_v35 }
 0x21c   :  { %v1631_v36 = vsub.f32 %v3981_v61, %v4492_v13  ;;  %v4055_v13 = vsub.f32 %v4000_v22, %v4508_v0  ;;  %v4133_v0 = vpack.c.bf16 %v1482_v24, %v1479_v18 }
 0x21d   :  { %v1625_v34 = vand.u32 4294901760, %v1624_v59  ;;  %v3003_v55 = vpack.c.bf16 %v1744_v1, %v1737_v23  ;;  %v4088_v23 = vpack.c.bf16 %v1530_v49, %v1527_v41  ;;  %v1757_v1 = vsub.f32 %v4043_v15, %v4505_v62 }
 0x21e   :  { %v1632_v47 = vand.u32 4294901760, %v1631_v36  ;;  %v4504_v59 = vand.u32 4294901760, %v4055_v13  ;;  %v4507_v36 = vand.u32 4294901760, %v4048_v21  ;;  %v1652_v26 = vsub.f32 %v4136_v35, %v4512_v4 }
 0x21f   :  { %3004 = vmatprep.subr.bf16.mxu0 %v3003_v55  ;;  %2968 = vmatprep.subr.bf16.mxu1 %v4088_v23  ;;  %v1758_v49 = vand.u32 4294901760, %v1757_v1  ;;  %v4117_v55 = vld [vmem:[%s4437_s4 + $0xe8] sm:$0xff]  ;;  %v4518_v1 = vand.u32 4294901760, %v4097_v53 }
 0x220   :  { %v3005_v57 = vpack.c.bf16 %v1632_v47, %v1625_v34  ;;  %v1638_v32 = vsub.f32 %v4055_v13, %v4504_v59  ;;  %v4106_v41 = vsub.f32 %v4048_v21, %v4507_v36  ;;  %v1645_v47 = vsub.f32 %v4062_v33, %v4506_v60  ;;  %v4127_v60 = vld [vmem:[%s4437_s4 + $0x60] sm:$0xff]  ;;  %2970 = vmatpush3.bf16.msra.mxu1 %v4133_v0 }
 0x221   :  { %v1500_v34 = vand.u32 4294901760, %v4082_v19  ;;  %v3007_v36 = vpack.c.bf16 %v1758_v49, %v1751_v52  ;;  %v1554_v52 = vand.u32 4294901760, %v4117_v55  ;;  %v4151_v27 = vsub.f32 %v4097_v53, %v4518_v1  ;;  %v1436_v49 = vld [vmem:[%s4437_s4 + $0x68] sm:$0xff] }
 0x222   :  { %4587 = vst [vmem:[#allocation10_spill] sm:$0xff] %v4106_v41  ;;  %3006 = vmatpush3.bf16.msra.mxu0 %v3005_v57  ;;  %v1639_v59 = vand.u32 4294901760, %v1638_v32  ;;  %v4516_v62 = vand.u32 4294901760, %v4106_v41  ;;  %v4121_v57 = vsub.f32 %v4067_v9, %v1548_v17  ;;  %v1646_v32 = vand.u32 4294901760, %v1645_v47 }
 0x223   :  { %v4143_v50 = vsub.f32 %v4082_v19, %v1500_v34  ;;  %3008 = vmatprep.subr.bf16.mxu0 %v3007_v36  ;;  %v1503_v18 = vand.u32 4294901760, %v4127_v60  ;;  %v4158_v19 = vpack.c.bf16 %v1536_v44, %v1533_v6  ;;  %v4171_v47 = vpack.c.bf16 %v4589_v14, %v1485_v28 }
 0x224   :  { %4588 = vst [vmem:[#allocation5_spill] sm:$0xff] %v4121_v57  ;;  %v1764_v9 = vsub.f32 %v4106_v41, %v4516_v62  ;;  %v4515_v63 = vand.u32 4294901760, %v4121_v57  ;;  %v3009_v16 = vpack.c.bf16 %v1646_v32, %v1639_v59  ;;  %v4513_v6 = vand.u32 4294901760, %v4151_v27 }
 0x225   :  { %v4514_v36 = vand.u32 4294901760, %v4143_v50  ;;  %v4178_v44 = vsub.f32 %v4117_v55, %v1554_v52  ;;  %2972 = vmatprep.subr.bf16.mxu1 %v4158_v19  ;;  %v4591_v28 = vand.u32 4294901760, %v3991_v25  ;;  %v4594_v14 = vand.u32 4294901760, %v4005_v29  ;;  %v1453_v55 = vld [vmem:[%s4437_s4 + $0xf0] sm:$0xff] }
 0x226   :  { %v1765_v24 = vand.u32 4294901760, %v1764_v9  ;;  %v1771_v59 = vsub.f32 %v4121_v57, %v4515_v63  ;;  %3010 = vmatpush3.bf16.msra.mxu0 %v3009_v16  ;;  %v4593_v16 = vand.u32 4294901760, %v4000_v22  ;;  %2974 = vmatpush3.bf16.msra.mxu1 %v4171_v47  ;;  %v1778_v11 = vsub.f32 %v4151_v27, %v4513_v6  ;;  %v1454_v22 = vld [vmem:[%s4437_s4 + $0xf8] sm:$0xff]  ;;  %v1437_v6 = vld [vmem:[%s4437_s4 + $0x70] sm:$0xff] }
 0x227   :  { %v1659_v56 = vsub.f32 %v4143_v50, %v4514_v36  ;;  %v4188_v9 = vpack.c.bf16 %v4591_v28, %v4590_v5  ;;  %v4517_v25 = vand.u32 4294901760, %v4178_v44  ;;  %v1506_v5 = vand.u32 4294901760, %v1436_v49 }
 0x228   :  { %v1772_v32 = vand.u32 4294901760, %v1771_v59  ;;  %v4194_v4 = vpack.c.bf16 %v4594_v14, %v4593_v16  ;;  %v1653_v59 = vand.u32 4294901760, %v1652_v26  ;;  %v4209_v16 = vsub.f32 %v4127_v60, %v1503_v18  ;;  %v1438_v60 = vld [vmem:[%s4437_s4 + $0x78] sm:$0xff] }
 0x229   :  { %4592 = vst [vmem:[#allocation6_spill] sm:$0xff] %v4188_v9  ;;  %v1660_v28 = vand.u32 4294901760, %v1659_v56  ;;  %2976 = vmatprep.subr.bf16.mxu1 %v4188_v9  ;;  %v4596_v26 = vand.u32 4294901760, %v4048_v21  ;;  %v1779_v36 = vand.u32 4294901760, %v1778_v11  ;;  %v1785_v63 = vsub.f32 %v4178_v44, %v4517_v25 }
 0x22a   :  { %4595 = vst [vmem:[#allocation12_spill] sm:$0xff] %v4194_v4  ;;  %v3011_v29 = vpack.c.bf16 %v1772_v32, %v1765_v24  ;;  %v4221_v24 = vsub.f32 %v1436_v49, %v1506_v5  ;;  %v1557_v32 = vand.u32 4294901760, %v1453_v55  ;;  %v1560_v56 = vand.u32 4294901760, %v1454_v22  ;;  %2978 = vmatpush3.bf16.msra.mxu1 %v4194_v4 }
 0x22b   :  { %v4213_v14 = vpack.c.bf16 %v1548_v17, %v4596_v26  ;;  %v3013_v21 = vpack.c.bf16 %v1660_v28, %v1653_v59  ;;  %v4521_v17 = vand.u32 4294901760, %v4209_v16  ;;  %v4227_v26 = vpack.c.bf16 %v1500_v34, %v1497_v7 }
 0x22c   :  { %3012 = vmatprep.subr.bf16.mxu0 %v3011_v29  ;;  %v1786_v62 = vand.u32 4294901760, %v1785_v63  ;;  %v4524_v11 = vand.u32 4294901760, %v4221_v24  ;;  %v4231_v25 = vsub.f32 %v1453_v55, %v1557_v32  ;;  %v1509_v49 = vand.u32 4294901760, %v1437_v6 }
 0x22d   :  { %4597 = vst [vmem:[#allocation14_spill] sm:$0xff] %v4213_v14  ;;  %4598 = vst [vmem:[#allocation7_spill] sm:$0xff] %v4227_v26  ;;  %3014 = vmatpush3.bf16.msra.mxu0 %v3013_v21  ;;  %v1666_v1 = vsub.f32 %v4209_v16, %v4521_v17  ;;  %2980 = vmatprep.subr.bf16.mxu1 %v4213_v14  ;;  %v4237_v59 = vsub.f32 %v1454_v22, %v1560_v56  ;;  %v1512_v29 = vand.u32 4294901760, %v1438_v60 }
 0x22e   :  { %v4599_v7 = vand.u32 4294901760, %v4097_v53  ;;  %v3015_v34 = vpack.c.bf16 %v1786_v62, %v1779_v36  ;;  %v1673_v55 = vsub.f32 %v4221_v24, %v4524_v11  ;;  %v1791_v28 = vand.u32 4294901760, %v4231_v25  ;;  %2982 = vmatpush3.bf16.msra.mxu1 %v4227_v26 }
 0x22f   :  { %v4247_v21 = vsub.f32 %v1437_v6, %v1509_v49  ;;  %v1667_v4 = vand.u32 4294901760, %v1666_v1  ;;  %v1798_v17 = vand.u32 4294901760, %v4237_v59  ;;  %v4250_v14 = vsub.f32 %v1438_v60, %v1512_v29 }
 0x230   :  { %v4241_v63 = vpack.c.bf16 %v1554_v52, %v4599_v7  ;;  %3016 = vmatprep.subr.bf16.mxu0 %v3015_v34  ;;  %v1674_v22 = vand.u32 4294901760, %v1673_v55  ;;  %v1792_v53 = vsub.f32 %v4231_v25, %v1791_v28  ;;  %v4255_v52 = vpack.c.bf16 %v1506_v5, %v1503_v18 }
 0x231   :  { %v1679_v62 = vand.u32 4294901760, %v4247_v21  ;;  %v1799_v36 = vsub.f32 %v4237_v59, %v1798_v17  ;;  %v1686_v6 = vand.u32 4294901760, %v4250_v14  ;;  %v4260_v1 = vpack.c.bf16 %v1560_v56, %v1557_v32 }
 0x232   :  { %2984 = vmatprep.subr.bf16.mxu1 %v4241_v63  ;;  %v3017_v60 = vpack.c.bf16 %v1674_v22, %v1667_v4  ;;  %v1793_v7 = vand.u32 4294901760, %v1792_v53  ;;  %v4265_v18 = vpack.c.bf16 %v1512_v29, %v1509_v49  ;;  %v3023_v32 = vpack.c.bf16 %v3810_v42, %v3808_v30 }
 0x233   :  { %v1680_v34 = vsub.f32 %v4247_v21, %v1679_v62  ;;  %v1800_v55 = vand.u32 4294901760, %v1799_v36  ;;  %v1687_v11 = vsub.f32 %v4250_v14, %v1686_v6  ;;  %2986 = vmatpush3.bf16.msra.mxu1 %v4255_v52  ;;  %v3035_v56 = vpack.c.bf16 %v3971_v43, %v3966_v38  ;;  %v3169_v36 = vld [vmem:[%s4433_s0] sm:$0xf]  ;;  %s3198_s0 = smov [#allocation2]  }
 0x234   :  { %3018 = vmatpush3.bf16.msra.mxu0 %v3017_v60  ;;  %2988 = vmatprep.subr.bf16.mxu1 %v4260_v1  ;;  %v3037_v49 = vpack.c.bf16 %v3981_v61, %v3976_v46  ;;  %v3041_v29 = vpack.c.bf16 %v4062_v33, %v4055_v13  ;;  %s2339_s21 = sshll.u32 %s3198_s0, 4  ;;  %s2340_s21 = int_to_ptr.vmem [resolvable:$true] %s2339_s21 }
 0x235   :  { %v1681_v26 = vand.u32 4294901760, %v1680_v34  ;;  %v3019_v5 = vpack.c.bf16 %v1800_v55, %v1793_v7  ;;  %v1688_v9 = vand.u32 4294901760, %v1687_v11  ;;  %v3039_v11 = vpack.c.bf16 %v4043_v15, %v4026_v8  ;;  %s3171_s22 = scalar_lea.vmem %s2340_s21, 32  ;;  %p3176_p1 = scmp.lt.s32.totalorder %s2340_s21, %s2340_s21 }
 0x236   :  { %v4292_v7 = vpack.c.bf16 %v1798_v17, %v1791_v28  ;;  %v4294_v34 = vpack.c.bf16 %v1686_v6, %v1679_v62  ;;  %p3172_p0 = scmp.ne.s32.totalorder %s2340_s21, %s3171_s22  ;;  %p3177_p2 = scmp.lt.s32.totalorder %s3171_s22, %s3171_s22 }
 0x237   :  { %3020 = vmatprep.subr.bf16.mxu0 %v3019_v5  ;;  %v3021_v4 = vpack.c.bf16 %v1688_v9, %v1681_v26  ;;  %2990 = vmatpush3.bf16.msra.mxu1 %v4265_v18  ;;  %v3043_v9 = vpack.c.bf16 %v4121_v57, %v4106_v41  ;;  %v4600_v41 = vld [vmem:[#allocation13_spill] sm:$0xff] }
 0x238   :  { %3024 = vmatprep.subr.bf16.mxu1 %v3023_v32  ;;  %p3178_p3 = por %p3177_p2, %p3176_p1 }
 0x239   :  { %3022 = vmatpush3.bf16.msra.mxu0 %v3021_v4 }
 0x23a   :  { %3056 = vmatprep.subr.bf16.mxu0 %v3892_v31  ;;  %p3179_p4 = pnand %p3178_p3, %p3172_p0 }
 0x2e0   :  { %v1406_v55 = vpop.f32.mrb[6].mxu0 }
 0x2e1   :  { %v1408_v5 = vpop.f32.mrb[7].mxu0 }
 0x2e4   :  { %v1178_v32 = vpop.f32.mrb[6].mxu1 }
 0x2e5   :  { %v3151_v4 = vadd.f32 %v1406_v55, %v1178_v32  ;;  %v1180_v26 = vpop.f32.mrb[7].mxu1 }
 0x2e6   :  { %v3152_v57 = vadd.f32 %v1408_v5, %v1180_v26  ;;  %v3031_v5 = vpack.c.bf16 %v3910_v51, %v3901_v2 }
 0x2e8   :  { %v1413_v22 = vcombine.low %v3151_v4, %v3152_v57  ;;  %v3033_v4 = vpack.c.bf16 %v3922_v40, %v3917_v3 }
 0x2ea   :  { %v1420_v33 = vrot.slane %v1413_v22, %v4600_v41  ;;  %v3025_v22 = vpack.c.bf16 %v3816_v20, %v3813_v48 }
 0x2ec   :  { %v1422_v53 = vmul.f32 %v3169_v36, %v1420_v33  ;;  %v3027_v36 = vpack.c.bf16 %v3826_v10, %v3821_v54 }
 0x2ee   :  { %v1462_v60 = vrot.slane %v1422_v53, %v4600_v41 }
 0x2f0   :  { %v1463_v17 = vcombine.high %v1462_v60, %v1462_v60  ;;  %v4301_v28 = vand.u32 4294901760, %v1462_v60 }
 0x2f2   :  { %v1562_v62 = vand.u32 4294901760, %v1463_v17  ;;  %v1569_v6 = vsub.f32 %v1462_v60, %v4301_v28  ;;  %v3029_v60 = vpack.c.bf16 %v3844_v58, %v3836_v37 }
 0x2f4   :  { %1803 = vmatprep.mubr.f32.mxu0 %v1562_v62  ;;  %v1563_v55 = vsub.f32 %v1463_v17, %v1562_v62  ;;  %v1570_v32 = vand.u32 4294901760, %v1569_v6  ;;  %v4601_v17 = vld [vmem:[#allocation6_spill] sm:$0xff] }
 0x2f5   :  { %1805 = vmatmul.mubr.f32.vlgmr.msra.gmra.mrb[8].mxu0 %v4301_v28 }
 0x2f6   :  { %3058 = vmatpush3.bf16.msra.mxu0 %v3903_v12  ;;  %v1564_v57 = vand.u32 4294901760, %v1563_v55  ;;  %v1571_v26 = vsub.f32 %v1569_v6, %v1570_v32 }
 0x2f7   :  { %3060 = vmatprep.subr.bf16.mxu0 %v4015_v45 }
 0x2f8   :  { %2047 = vmatprep.mubr.f32.mxu0 %v1564_v57  ;;  %v1565_v33 = vsub.f32 %v1563_v55, %v1564_v57  ;;  %v1572_v53 = vand.u32 4294901760, %v1571_v26  ;;  %v4602_v57 = vld [vmem:[#allocation12_spill] sm:$0xff]  ;;  %v4604_v26 = vld [vmem:[#allocation7_spill] sm:$0xff] }
 0x2fa   :  { %3062 = vmatpush3.bf16.msra.mxu0 %v4032_v39  ;;  %v1566_v41 = vand.u32 4294901760, %v1565_v33  ;;  %v4605_v33 = vpack.c.bf16 %v4143_v50, %v4136_v35 }
 0x2fb   :  { %3064 = vmatprep.subr.bf16.mxu0 %v4088_v23 }
 0x2fc   :  { %1567 = vmatprep.mubr.f32.mxu1 %v1566_v41 }
 0x2fd   :  { %1573 = vmatmul.mubr.f32.vlgmr.msra.gmra.mrb[8].mxu1 %v1572_v53 }
 0x2fe   :  { %3026 = vmatpush3.bf16.msra.mxu1 %v3025_v22  ;;  %3066 = vmatpush3.bf16.msra.mxu0 %v4133_v0 }
 0x2ff   :  { %1940 = vmatprep.mubr.f32.mxu1 %v1563_v55  ;;  %3028 = vmatprep.subr.bf16.mxu1 %v3027_v36  ;;  %v4603_v55 = vld [vmem:[#allocation14_spill] sm:$0xff] }
 0x300   :  { %3068 = vmatprep.subr.bf16.mxu0 %v4158_v19 }
 0x302   :  { %3030 = vmatpush3.bf16.msra.mxu1 %v3029_v60  ;;  %3070 = vmatpush3.bf16.msra.mxu0 %v4171_v47 }
 0x303   :  { %3032 = vmatprep.subr.bf16.mxu1 %v3031_v5  ;;  %3072 = vmatprep.subr.bf16.mxu0 %v4601_v17  ;;  %v4638_v5 = vand.u32 4294901760, %v4178_v44 }
 0x306   :  { %3034 = vmatpush3.bf16.msra.mxu1 %v3033_v4  ;;  %3074 = vmatpush3.bf16.msra.mxu0 %v4602_v57 }
 0x307   :  { %3036 = vmatprep.subr.bf16.mxu1 %v3035_v56  ;;  %3076 = vmatprep.subr.bf16.mxu0 %v4603_v55  ;;  %v4606_v56 = vpack.c.bf16 %v4178_v44, %v4151_v27 }
 0x30a   :  { %3038 = vmatpush3.bf16.msra.mxu1 %v3037_v49  ;;  %3078 = vmatpush3.bf16.msra.mxu0 %v4604_v26  ;;  %v4607_v49 = vpack.c.bf16 %v4221_v24, %v4209_v16 }
 0x30b   :  { %3040 = vmatprep.subr.bf16.mxu1 %v3039_v11  ;;  %3080 = vmatprep.subr.bf16.mxu0 %v4241_v63  ;;  %v4608_v11 = vpack.c.bf16 %v4237_v59, %v4231_v25 }
 0x30e   :  { %3042 = vmatpush3.bf16.msra.mxu1 %v3041_v29  ;;  %3082 = vmatpush3.bf16.msra.mxu0 %v4255_v52  ;;  %v4609_v29 = vand.u32 4294901760, %v3808_v30  ;;  %v4614_v30 = vand.u32 4294901760, %v3821_v54  ;;  %v4620_v54 = vand.u32 4294901760, %v3917_v3  ;;  %v4626_v3 = vand.u32 4294901760, %v4026_v8 }
 0x30f   :  { %3044 = vmatprep.subr.bf16.mxu1 %v3043_v9  ;;  %3084 = vmatprep.subr.bf16.mxu0 %v4260_v1  ;;  %v4610_v9 = vand.u32 4294901760, %v3810_v42  ;;  %v4615_v42 = vand.u32 4294901760, %v3826_v10  ;;  %v4621_v10 = vand.u32 4294901760, %v3922_v40  ;;  %v4627_v40 = vand.u32 4294901760, %v4043_v15 }
 0x310   :  { %v4635_v8 = vand.u32 4294901760, %v4136_v35  ;;  %v4636_v15 = vand.u32 4294901760, %v4143_v50 }
 0x311   :  { %v3087_v41 = vpack.c.bf16 %v4610_v9, %v4609_v29  ;;  %v3091_v25 = vpack.c.bf16 %v4615_v42, %v4614_v30  ;;  %v3097_v59 = vpack.c.bf16 %v4621_v10, %v4620_v54  ;;  %v939_v29 = vpop.xlane.xlu0 %938 }
 0x312   :  { %3046 = vmatpush3.bf16.msra.mxu1 %v4605_v33  ;;  %3086 = vmatpush3.bf16.msra.mxu0 %v4265_v18  ;;  %v3109_v60 = vpack.c.bf16 %v4636_v15, %v4635_v8  ;;  %3167 = vrcp.f32 %v939_v29 }
 0x313   :  { %3048 = vmatprep.subr.bf16.mxu1 %v4606_v56  ;;  %3120 = vmatprep.subr.bf16.mxu0 %v3892_v31  ;;  %v4611_v31 = vpack.c.bf16 %v4250_v14, %v4247_v21 }
 0x315   :  { %2051 = vmatmul.mubr.f32.vlgmr.msra.gmra.mrb[10].mxu0 %v1570_v32  ;;  %v4613_v32 = vand.u32 4294901760, %v3816_v20  ;;  %v4619_v20 = vand.u32 4294901760, %v3910_v51  ;;  %v4625_v51 = vand.u32 4294901760, %v3981_v61 }
 0x316   :  { %3050 = vmatpush3.bf16.msra.mxu1 %v4607_v49  ;;  %3122 = vmatpush3.bf16.msra.mxu0 %v3903_v12  ;;  %v4612_v12 = vand.u32 4294901760, %v3813_v48  ;;  %v4618_v48 = vand.u32 4294901760, %v3901_v2  ;;  %v4624_v2 = vand.u32 4294901760, %v3976_v46  ;;  %v4631_v46 = vld [vmem:[#allocation10_spill] sm:$0xff] }
 0x317   :  { %2321 = vmatprep.mubr.f32.mxu0 %v1562_v62  ;;  %3052 = vmatprep.subr.bf16.mxu1 %v4608_v11  ;;  %v4632_v61 = vand.u32 4294901760, %v4631_v46 }
 0x318   :  { %3124 = vmatprep.subr.bf16.mxu0 %v4015_v45  ;;  %v3089_v22 = vpack.c.bf16 %v4613_v32, %v4612_v12  ;;  %v4616_v45 = vand.u32 4294901760, %v3836_v37  ;;  %v4622_v37 = vand.u32 4294901760, %v3966_v38  ;;  %v4628_v38 = vand.u32 4294901760, %v4055_v13 }
 0x319   :  { %v4637_v13 = vand.u32 4294901760, %v4151_v27 }
 0x31a   :  { %3054 = vmatpush3.bf16.msra.mxu1 %v4611_v31  ;;  %3126 = vmatpush3.bf16.msra.mxu0 %v4032_v39  ;;  %v4617_v39 = vand.u32 4294901760, %v3844_v58  ;;  %v4623_v58 = vand.u32 4294901760, %v3971_v43  ;;  %v4629_v43 = vld [vmem:[#allocation8_spill] sm:$0xff] }
 0x31b   :  { %3088 = vmatprep.subr.bf16.mxu1 %v3087_v41  ;;  %3128 = vmatprep.subr.bf16.mxu0 %v4088_v23  ;;  %v3095_v23 = vpack.c.bf16 %v4619_v20, %v4618_v48  ;;  %v4630_v21 = vand.u32 4294901760, %v4629_v43  ;;  %v3111_v4 = vpack.c.bf16 %v4638_v5, %v4637_v13 }
 0x31c   :  { %v3093_v14 = vpack.c.bf16 %v4617_v39, %v4616_v45 }
 0x31d   :  { %1943 = vmatmul.mubr.f32.vlgmr.msra.gmra.mrb[10].mxu1 %v1569_v6  ;;  %v4633_v6 = vld [vmem:[#allocation5_spill] sm:$0xff] }
 0x31e   :  { %3090 = vmatpush3.bf16.msra.mxu1 %v3089_v22  ;;  %2217 = vmatprep.mubr.f32.mxu1 %v1562_v62  ;;  %v3105_v62 = vpack.c.bf16 %v4630_v21, %v4628_v38  ;;  %v4634_v53 = vand.u32 4294901760, %v4633_v6  ;;  %v3168_v22 = vpop.eup %3167 }
 0x31f   :  { %3130 = vmatpush3.bf16.msra.mxu0 %v4133_v0  ;;  %3092 = vmatprep.subr.bf16.mxu1 %v3091_v25  ;;  %v3099_v0 = vpack.c.bf16 %v4623_v58, %v4622_v37 }
 0x320   :  { %3132 = vmatprep.subr.bf16.mxu0 %v4158_v19  ;;  %v3101_v19 = vpack.c.bf16 %v4625_v51, %v4624_v2  ;;  %v3107_v36 = vpack.c.bf16 %v4634_v53, %v4632_v61 }
 0x322   :  { %3094 = vmatpush3.bf16.msra.mxu1 %v3093_v14 }
 0x323   :  { %3134 = vmatpush3.bf16.msra.mxu0 %v4171_v47  ;;  %3096 = vmatprep.subr.bf16.mxu1 %v3095_v23  ;;  %v3103_v47 = vpack.c.bf16 %v4627_v40, %v4626_v3 }
 0x324   :  { %3136 = vmatprep.subr.bf16.mxu0 %v4601_v17  ;;  %v4639_v17 = vand.u32 4294901760, %v4209_v16 }
 0x326   :  { %3098 = vmatpush3.bf16.msra.mxu1 %v3097_v59 }
 0x327   :  { %3138 = vmatpush3.bf16.msra.mxu0 %v4602_v57  ;;  %3100 = vmatprep.subr.bf16.mxu1 %v3099_v0 }
 0x328   :  { %3140 = vmatprep.subr.bf16.mxu0 %v4603_v55 }
 0x32a   :  { %3102 = vmatpush3.bf16.msra.mxu1 %v3101_v19 }
 0x32b   :  { %3142 = vmatpush3.bf16.msra.mxu0 %v4604_v26  ;;  %3104 = vmatprep.subr.bf16.mxu1 %v3103_v47 }
 0x32c   :  { %3144 = vmatprep.subr.bf16.mxu0 %v4241_v63  ;;  %v4640_v63 = vand.u32 4294901760, %v4221_v24 }
 0x32e   :  { %3106 = vmatpush3.bf16.msra.mxu1 %v3105_v62  ;;  %v3113_v57 = vpack.c.bf16 %v4640_v63, %v4639_v17 }
 0x32f   :  { %3146 = vmatpush3.bf16.msra.mxu0 %v4255_v52  ;;  %3108 = vmatprep.subr.bf16.mxu1 %v3107_v36 }
 0x330   :  { %3148 = vmatprep.subr.bf16.mxu0 %v4260_v1 }
 0x332   :  { %3110 = vmatpush3.bf16.msra.mxu1 %v3109_v60 }
 0x333   :  { %3150 = vmatpush3.bf16.msra.mxu0 %v4265_v18  ;;  %3112 = vmatprep.subr.bf16.mxu1 %v3111_v4 }
 0x336   :  { %2323 = vmatmul.mubr.f32.vlgmr.msra.gmra.mrb[12].mxu0 %v4301_v28  ;;  %3114 = vmatpush3.bf16.msra.mxu1 %v3113_v57 }
 0x337   :  { %3116 = vmatprep.subr.bf16.mxu1 %v4292_v7 }
 0x33a   :  { %3118 = vmatpush3.bf16.msra.mxu1 %v4294_v34 }
 0x33d   :  { %2219 = vmatmul.mubr.f32.vlgmr.msra.gmra.mrb[12].mxu1 %v4301_v28 }
 0x3c8   :  { %v2624_v50 = vpop.f32.mrb[8].mxu0 }
 0x3c9   :  { %v2625_v35 = vpop.f32.mrb[9].mxu0 }
 0x3ca   :  { %v2626_v27 = vadd.f32 %v2625_v35, %v2624_v50 }
 0x3d0   :  { %v2589_v44 = vpop.f32.mrb[8].mxu1 }
 0x3d1   :  { %v2590_v16 = vpop.f32.mrb[9].mxu1 }
 0x3d2   :  { %v2591_v52 = vadd.f32 %v2590_v16, %v2589_v44 }
 0x3d4   :  { %v1807_v24 = vadd.f32 %v2626_v27, %v2591_v52 }
 0x3e8   :  { %v2694_v1 = vpop.f32.mrb[10].mxu0 }
 0x3e9   :  { %v2695_v55 = vpop.f32.mrb[11].mxu0 }
 0x3ea   :  { %v2696_v18 = vadd.f32 %v2695_v55, %v2694_v1 }
 0x3f0   :  { %v2659_v26 = vpop.f32.mrb[10].mxu1 }
 0x3f1   :  { %v2660_v33 = vpop.f32.mrb[11].mxu1 }
 0x3f2   :  { %v2661_v56 = vadd.f32 %v2660_v33, %v2659_v26 }
 0x3f4   :  { %v1945_v49 = vadd.f32 %v2661_v56, %v1807_v24 }
 0x3f6   :  { %v2053_v11 = vadd.f32 %v2696_v18, %v1945_v49 }
 0x409   :  { %v2764_v7 = vpop.f32.mrb[12].mxu0 }
 0x40a   :  { %v2765_v34 = vpop.f32.mrb[13].mxu0 }
 0x40b   :  { %v2766_v9 = vadd.f32 %v2765_v34, %v2764_v7 }
 0x410   :  { %v2729_v28 = vpop.f32.mrb[12].mxu1 }
 0x411   :  { %v2730_v41 = vpop.f32.mrb[13].mxu1 }
 0x412   :  { %v2731_v31 = vadd.f32 %v2730_v41, %v2729_v28 }
 0x414   :  { %v2221_v12 = vadd.f32 %v2731_v31, %v2053_v11 }
 0x416   :  { %v2325_v32 = vadd.f32 %v2766_v9, %v2221_v12 }
 0x418   :  { %v2330_v30 = vmul.f32 %v3168_v22, %v2325_v32 }
 0x41a   :  { %2332 = vst.msk [vmem:[#allocation2] sm:$0x3] %vm2331_vm3, %v2330_v30 }
 0x41b   :  { %3182 = shalt.err (!%p3179_p4)
}
 0x41c   :  { %s3183_s25 = scalar_lea.hbm %s4438_s5, 32 }
 0x41d   :  { %p3184_p5 = scmp.ne.s32.totalorder %s4438_s5, %s3183_s25  ;;  %p3187_p6 = scmp.lt.u32.totalorder %s3183_s25, %s4438_s5 }
 0x41f   :  { %p3189_p7 = pnand %p3187_p6, %p3184_p5 }
 0x421   :  { %3192 = shalt.err (!%p3189_p7)
}
 0x422   :  { %2342 = dma.vmem_to_hbm [thread:$0]  %s2340_s21, 32, %s4438_s5, [#allocation3]  }
 0x423   :  { %3193 = dma.done.wait [#allocation3], 32  }
 0x424   :  { %3194 = vsyncadd [#allocation3], 4294967264 }
 0x425   :  { %2346 = vsyncpa [#allocation3], 1 }

</bundles_post_ra>
